<compile_context>
chip_gen: v7x
topology: tpu7x:2x2x1
jax: 0.10.0
libtpu: 0.0.40
codegen_flags: <defaults>
</compile_context>

<pallas_src>
import functools

import jax
import jax.numpy as jnp
import numpy as np
from jax.experimental import pallas as pl
from jax.experimental.pallas import tpu as pltpu


def _round_up(x, m):
    return ((x + m - 1) // m) * m


def _divisors(n):
    return [d for d in range(1, n + 1) if n % d == 0]


def _pick_channel_block(C, row_bytes, budget=1 << 20):
    # Divisor of C that is sublane-friendly (multiple of 8) or C itself;
    # largest one whose per-batch-row x slab fits the budget.
    cands = [d for d in _divisors(C) if d % 8 == 0 or d == C]
    fits = [d for d in cands if d * row_bytes <= budget]
    return max(fits) if fits else min(cands)


def _pick_batch_block(N, tc, row_bytes, budget=4 << 20):
    fits = [d for d in _divisors(N) if d * tc * row_bytes <= budget]
    return max(fits) if fits else 1


def _make_kernel(C_total, H, W, K, NB, LPAD):
    HW = H * W
    pad = (K - 1) // 2
    KK = K * K
    inv_c = 1.0 / float(C_total)

    def kernel(w_ref, col_ref, x_ref, o_ref, sum_ref, max_ref):
        # w_ref   : (2*K*K,)           SMEM  flattened conv weights
        # col_ref : (1, HW)            VMEM  column index (p % W) per flat pos
        # x_ref   : (NB, TC, HW)       VMEM  one batch/channel tile of x
        # o_ref   : (NB, HW)           VMEM  sigmoid(conv) output (flat, lane-dense)
        # sum_ref : (NB, HW + 2*LPAD)  VMEM  zero-haloed running channel sum
        # max_ref : (NB, HW + 2*LPAD)  VMEM  zero-haloed running channel max
        c_blk = pl.program_id(1)

        xb = x_ref[...].astype(jnp.float32)          # (NB, TC, HW)
        psum = jnp.sum(xb, axis=1)                   # (NB, HW)
        pmax = jnp.max(xb, axis=1)                   # (NB, HW)

        @pl.when(c_blk == 0)
        def _():
            # Zero the whole padded buffers: the halo must stay exactly 0 so
            # that conv taps falling outside the image read zeros, matching
            # the reference conv's zero padding.
            sum_ref[...] = jnp.zeros_like(sum_ref)
            max_ref[...] = jnp.zeros_like(max_ref)
            sum_ref[:, pl.ds(LPAD, HW)] = psum
            max_ref[:, pl.ds(LPAD, HW)] = pmax

        @pl.when(c_blk > 0)
        def _():
            sum_ref[:, pl.ds(LPAD, HW)] = sum_ref[:, pl.ds(LPAD, HW)] + psum
            max_ref[:, pl.ds(LPAD, HW)] = jnp.maximum(
                max_ref[:, pl.ds(LPAD, HW)], pmax)

        @pl.when(c_blk == pl.num_programs(1) - 1)
        def _():
            avg_p = sum_ref[...] * inv_c             # (NB, HW+2*LPAD); halo stays 0
            mx_p = max_ref[...]
            col = col_ref[...]                       # (1, HW) int32

            # 7x7 conv over the zero-haloed flat maps.  Tap (kh, kw) is a
            # static slice at flat offset (kh-pad)*W + (kw-pad); rows outside
            # the image land in the zero halo automatically, columns that
            # wrapped across a row are masked once per kw (not per tap).
            acc = None
            for kw in range(K):
                dw = kw - pad
                part_a = None
                part_m = None
                for kh in range(K):
                    off = LPAD + (kh - pad) * W + dw
                    ta = avg_p[:, off:off + HW] * w_ref[kh * K + kw]
                    tm = mx_p[:, off:off + HW] * w_ref[KK + kh * K + kw]
                    part_a = ta if part_a is None else part_a + ta
                    part_m = tm if part_m is None else part_m + tm
                part = part_a + part_m
                if dw != 0:
                    ok = jnp.logical_and(col >= -dw, col < W - dw)
                    part = jnp.where(ok, part, 0.0)
                acc = part if acc is None else acc + part

            o_ref[...] = jax.nn.sigmoid(acc).astype(o_ref.dtype)

    return kernel


@functools.partial(jax.jit, static_argnames=("kernel_size",))
def spatial_attention(x, weight, kernel_size=7):
    """x: (N, C, H, W); weight: (1, 2, K, K) -> sigmoid attention map (N, 1, H, W)."""
    assert kernel_size in (3, 7), "kernel size must be 3 or 7"
    N, C, H, W = x.shape
    K = kernel_size
    pad = (K - 1) // 2
    HW = H * W

    # Lane-dense view of x; free (contiguous) for NCHW.
    x_flat = x.reshape(N, C, HW)
    # Flatten weights: [in_ch=0 (avg) taps..., in_ch=1 (max) taps...].
    w_flat = weight.reshape(-1).astype(jnp.float32)
    # Column index of every flattened spatial position (for row-wrap masking).
    col_idx = (jnp.arange(HW, dtype=jnp.int32) % W).reshape(1, HW)

    elem = x.dtype.itemsize
    TC = _pick_channel_block(C, HW * elem)        # channel tile (grid reduction)
    NB = _pick_batch_block(N, TC, HW * elem)      # batch rows per grid step
    grid = (N // NB, C // TC)

    # Halo of the padded flat maps; 128-lane aligned so interior stores are
    # aligned.  Must cover the largest tap offset pad*W + pad.
    LPAD = _round_up(pad * W + pad, 128)
    WTOT = HW + 2 * LPAD

    kernel = _make_kernel(C, H, W, K, NB, LPAD)

    out_flat = pl.pallas_call(
        kernel,
        out_shape=jax.ShapeDtypeStruct((N, HW), x.dtype),
        grid=grid,
        in_specs=[
            pl.BlockSpec(memory_space=pltpu.MemorySpace.SMEM),      # conv weights
            pl.BlockSpec((1, HW), lambda n, c: (0, 0)),             # column index
            pl.BlockSpec((NB, TC, HW), lambda n, c: (n, c, 0)),     # x tile
        ],
        out_specs=pl.BlockSpec((NB, HW), lambda n, c: (n, 0)),
        scratch_shapes=[
            pltpu.VMEM((NB, WTOT), jnp.float32),   # running channel sum (haloed)
            pltpu.VMEM((NB, WTOT), jnp.float32),   # running channel max (haloed)
        ],
        compiler_params=pltpu.CompilerParams(
            dimension_semantics=("parallel", "arbitrary")),
    )(w_flat, col_idx, x_flat)

    return out_flat.reshape(N, 1, H, W)


def _reference(x, weight):
    avg = jnp.mean(x, axis=1, keepdims=True)
    mx = jnp.max(x, axis=1, keepdims=True)
    cat = jnp.concatenate([avg, mx], axis=1)
    pad = (weight.shape[-1] - 1) // 2
    y = jax.lax.conv_general_dilated(
        cat, weight, window_strides=(1, 1),
        padding=[(pad, pad), (pad, pad)],
        dimension_numbers=("NCHW", "OIHW", "NCHW"))
    return jax.nn.sigmoid(y)


if __name__ == "__main__":
    key = jax.random.PRNGKey(0)
    kx, kw = jax.random.split(key)

    N, C, H, W = 2, 4, 16, 16
    K = 7

    x = jax.random.normal(kx, (N, C, H, W), dtype=jnp.float32)
    # Deterministic synthetic conv weight (nn.Conv2d(2, 1, 7, bias=False) shape).
    weight = jax.random.normal(kw, (1, 2, K, K), dtype=jnp.float32) * 0.05

    out = jax.block_until_ready(spatial_attention(x, weight, kernel_size=K))
    ref = jax.block_until_ready(_reference(x, weight))

    np.testing.assert_allclose(np.asarray(out), np.asarray(ref),
                               rtol=1e-5, atol=1e-5)
    assert out.shape == (N, 1, H, W)
    print("KERNEL_OK")
</pallas_src>

<mosaic_0001>
module attributes {stable_mosaic.version = 11 : i64} {
  func.func @kernel(%arg0: i32, %arg1: i32, %arg2: memref<98xf32, #tpu.memory_space<smem>>, %arg3: memref<1x256xi32, #tpu.memory_space<vmem>>, %arg4: memref<2x4x256xf32, #tpu.memory_space<vmem>>, %arg5: memref<2x256xf32, #tpu.memory_space<vmem>>, %arg6: memref<2x512xf32, #tpu.memory_space<vmem>>, %arg7: memref<2x512xf32, #tpu.memory_space<vmem>>) attributes {dimension_semantics = [#tpu.dimension_semantics<parallel>, #tpu.dimension_semantics<arbitrary>], iteration_bounds = array<i64: 1, 1>, scalar_prefetch = 0 : i64, scratch_operands = 2 : i64, tpu.core_type = #tpu.core_type<tc>, window_params = [{transform_indices = @transform_0, window_bounds = array<i64: 98>}, {pipeline_mode = #tpu.pipeline_mode<synchronous>, transform_indices = @transform_1, window_bounds = array<i64: 1, 256>}, {transform_indices = @transform_2, window_bounds = array<i64: 2, 4, 256>}, {transform_indices = @transform_3, window_bounds = array<i64: 2, 256>}]} {
    %c0 = arith.constant 0 : index
    %c0_0 = arith.constant 0 : index
    %c0_1 = arith.constant 0 : index
    %0 = vector.load %arg4[%c0, %c0_0, %c0_1] : memref<2x4x256xf32, #tpu.memory_space<vmem>>, vector<2x4x256xf32>
    %cst = arith.constant dense<0.000000e+00> : vector<2x256xf32>
    %1 = vector.multi_reduction <add>, %0, %cst [1] : vector<2x4x256xf32> to vector<2x256xf32>
    %cst_2 = arith.constant dense<0xFF800000> : vector<2x256xf32>
    %2 = vector.multi_reduction <maximumf>, %0, %cst_2 [1] : vector<2x4x256xf32> to vector<2x256xf32>
    %c0_i32 = arith.constant 0 : i32
    %3 = arith.cmpi eq, %arg1, %c0_i32 : i32
    %4 = arith.extui %3 : i1 to i32
    %c0_i32_3 = arith.constant 0 : i32
    %5 = arith.cmpi ne, %4, %c0_i32_3 : i32
    scf.if %5 {
      %cst_8 = arith.constant 0.000000e+00 : f32
      %12 = vector.broadcast %cst_8 : f32 to vector<2x512xf32>
      %c0_9 = arith.constant 0 : index
      %c0_10 = arith.constant 0 : index
      %13 = vector.load %arg6[%c0_9, %c0_10] : memref<2x512xf32, #tpu.memory_space<vmem>>, vector<2x512xf32>
      tpu.vector_store %arg6[%c0_9, %c0_10], %12 {strides = array<i32>} : memref<2x512xf32, #tpu.memory_space<vmem>>, vector<2x512xf32>,
      %cst_11 = arith.constant 0.000000e+00 : f32
      %14 = vector.broadcast %cst_11 : f32 to vector<2x512xf32>
      %c0_12 = arith.constant 0 : index
      %c0_13 = arith.constant 0 : index
      %15 = vector.load %arg7[%c0_12, %c0_13] : memref<2x512xf32, #tpu.memory_space<vmem>>, vector<2x512xf32>
      tpu.vector_store %arg7[%c0_12, %c0_13], %14 {strides = array<i32>} : memref<2x512xf32, #tpu.memory_space<vmem>>, vector<2x512xf32>,
      %c0_14 = arith.constant 0 : index
      %c128 = arith.constant 128 : index
      %16 = vector.load %arg6[%c0_14, %c128] : memref<2x512xf32, #tpu.memory_space<vmem>>, vector<2x256xf32>
      tpu.vector_store %arg6[%c0_14, %c128], %1 {strides = array<i32>} : memref<2x512xf32, #tpu.memory_space<vmem>>, vector<2x256xf32>,
      %c0_15 = arith.constant 0 : index
      %c128_16 = arith.constant 128 : index
      %17 = vector.load %arg7[%c0_15, %c128_16] : memref<2x512xf32, #tpu.memory_space<vmem>>, vector<2x256xf32>
      tpu.vector_store %arg7[%c0_15, %c128_16], %2 {strides = array<i32>} : memref<2x512xf32, #tpu.memory_space<vmem>>, vector<2x256xf32>,
    } else {
    }
    %c0_i32_4 = arith.constant 0 : i32
    %6 = arith.cmpi sgt, %arg1, %c0_i32_4 : i32
    %7 = arith.extui %6 : i1 to i32
    %c0_i32_5 = arith.constant 0 : i32
    %8 = arith.cmpi ne, %7, %c0_i32_5 : i32
    scf.if %8 {
      %c0_8 = arith.constant 0 : index
      %c128 = arith.constant 128 : index
      %12 = vector.load %arg6[%c0_8, %c128] : memref<2x512xf32, #tpu.memory_space<vmem>>, vector<2x256xf32>
      %13 = arith.addf %12, %1 : vector<2x256xf32>
      %c0_9 = arith.constant 0 : index
      %c128_10 = arith.constant 128 : index
      %14 = vector.load %arg6[%c0_9, %c128_10] : memref<2x512xf32, #tpu.memory_space<vmem>>, vector<2x256xf32>
      tpu.vector_store %arg6[%c0_9, %c128_10], %13 {strides = array<i32>} : memref<2x512xf32, #tpu.memory_space<vmem>>, vector<2x256xf32>,
      %c0_11 = arith.constant 0 : index
      %c128_12 = arith.constant 128 : index
      %15 = vector.load %arg7[%c0_11, %c128_12] : memref<2x512xf32, #tpu.memory_space<vmem>>, vector<2x256xf32>
      %16 = arith.maximumf %15, %2 : vector<2x256xf32>
      %c0_13 = arith.constant 0 : index
      %c128_14 = arith.constant 128 : index
      %17 = vector.load %arg7[%c0_13, %c128_14] : memref<2x512xf32, #tpu.memory_space<vmem>>, vector<2x256xf32>
      tpu.vector_store %arg7[%c0_13, %c128_14], %16 {strides = array<i32>} : memref<2x512xf32, #tpu.memory_space<vmem>>, vector<2x256xf32>,
    } else {
    }
    %c0_i32_6 = arith.constant 0 : i32
    %9 = arith.cmpi eq, %arg1, %c0_i32_6 : i32
    %10 = arith.extui %9 : i1 to i32
    %c0_i32_7 = arith.constant 0 : i32
    %11 = arith.cmpi ne, %10, %c0_i32_7 : i32
    scf.if %11 {
      %c0_8 = arith.constant 0 : index
      %c0_9 = arith.constant 0 : index
      %12 = vector.load %arg6[%c0_8, %c0_9] : memref<2x512xf32, #tpu.memory_space<vmem>>, vector<2x512xf32>
      %cst_10 = arith.constant 2.500000e-01 : f32
      %13 = vector.broadcast %cst_10 : f32 to vector<2x512xf32>
      %14 = arith.mulf %12, %13 : vector<2x512xf32>
      %c0_11 = arith.constant 0 : index
      %c0_12 = arith.constant 0 : index
      %15 = vector.load %arg7[%c0_11, %c0_12] : memref<2x512xf32, #tpu.memory_space<vmem>>, vector<2x512xf32>
      %c0_13 = arith.constant 0 : index
      %c0_14 = arith.constant 0 : index
      %16 = vector.load %arg3[%c0_13, %c0_14] : memref<1x256xi32, #tpu.memory_space<vmem>>, vector<1x256xi32>
      %17 = vector.extract_strided_slice %14 {offsets = [0, 77], sizes = [2, 256], strides = [1, 1]} : vector<2x512xf32> to vector<2x256xf32>
      %c0_15 = arith.constant 0 : index
      %18 = memref.load %arg2[%c0_15] : memref<98xf32, #tpu.memory_space<smem>>
      %19 = vector.broadcast %18 : f32 to vector<2x256xf32>
      %20 = arith.mulf %17, %19 : vector<2x256xf32>
      %21 = vector.extract_strided_slice %15 {offsets = [0, 77], sizes = [2, 256], strides = [1, 1]} : vector<2x512xf32> to vector<2x256xf32>
      %c49 = arith.constant 49 : index
      %22 = memref.load %arg2[%c49] : memref<98xf32, #tpu.memory_space<smem>>
      %23 = vector.broadcast %22 : f32 to vector<2x256xf32>
      %24 = arith.mulf %21, %23 : vector<2x256xf32>
      %25 = vector.extract_strided_slice %14 {offsets = [0, 93], sizes = [2, 256], strides = [1, 1]} : vector<2x512xf32> to vector<2x256xf32>
      %c7 = arith.constant 7 : index
      %26 = memref.load %arg2[%c7] : memref<98xf32, #tpu.memory_space<smem>>
      %27 = vector.broadcast %26 : f32 to vector<2x256xf32>
      %28 = arith.mulf %25, %27 : vector<2x256xf32>
      %29 = vector.extract_strided_slice %15 {offsets = [0, 93], sizes = [2, 256], strides = [1, 1]} : vector<2x512xf32> to vector<2x256xf32>
      %c56 = arith.constant 56 : index
      %30 = memref.load %arg2[%c56] : memref<98xf32, #tpu.memory_space<smem>>
      %31 = vector.broadcast %30 : f32 to vector<2x256xf32>
      %32 = arith.mulf %29, %31 : vector<2x256xf32>
      %33 = arith.addf %20, %28 : vector<2x256xf32>
      %34 = arith.addf %24, %32 : vector<2x256xf32>
      %35 = vector.extract_strided_slice %14 {offsets = [0, 109], sizes = [2, 256], strides = [1, 1]} : vector<2x512xf32> to vector<2x256xf32>
      %c14 = arith.constant 14 : index
      %36 = memref.load %arg2[%c14] : memref<98xf32, #tpu.memory_space<smem>>
      %37 = vector.broadcast %36 : f32 to vector<2x256xf32>
      %38 = arith.mulf %35, %37 : vector<2x256xf32>
      %39 = vector.extract_strided_slice %15 {offsets = [0, 109], sizes = [2, 256], strides = [1, 1]} : vector<2x512xf32> to vector<2x256xf32>
      %c63 = arith.constant 63 : index
      %40 = memref.load %arg2[%c63] : memref<98xf32, #tpu.memory_space<smem>>
      %41 = vector.broadcast %40 : f32 to vector<2x256xf32>
      %42 = arith.mulf %39, %41 : vector<2x256xf32>
      %43 = arith.addf %33, %38 : vector<2x256xf32>
      %44 = arith.addf %34, %42 : vector<2x256xf32>
      %45 = vector.extract_strided_slice %14 {offsets = [0, 125], sizes = [2, 256], strides = [1, 1]} : vector<2x512xf32> to vector<2x256xf32>
      %c21 = arith.constant 21 : index
      %46 = memref.load %arg2[%c21] : memref<98xf32, #tpu.memory_space<smem>>
      %47 = vector.broadcast %46 : f32 to vector<2x256xf32>
      %48 = arith.mulf %45, %47 : vector<2x256xf32>
      %49 = vector.extract_strided_slice %15 {offsets = [0, 125], sizes = [2, 256], strides = [1, 1]} : vector<2x512xf32> to vector<2x256xf32>
      %c70 = arith.constant 70 : index
      %50 = memref.load %arg2[%c70] : memref<98xf32, #tpu.memory_space<smem>>
      %51 = vector.broadcast %50 : f32 to vector<2x256xf32>
      %52 = arith.mulf %49, %51 : vector<2x256xf32>
      %53 = arith.addf %43, %48 : vector<2x256xf32>
      %54 = arith.addf %44, %52 : vector<2x256xf32>
      %55 = vector.extract_strided_slice %14 {offsets = [0, 141], sizes = [2, 256], strides = [1, 1]} : vector<2x512xf32> to vector<2x256xf32>
      %c28 = arith.constant 28 : index
      %56 = memref.load %arg2[%c28] : memref<98xf32, #tpu.memory_space<smem>>
      %57 = vector.broadcast %56 : f32 to vector<2x256xf32>
      %58 = arith.mulf %55, %57 : vector<2x256xf32>
      %59 = vector.extract_strided_slice %15 {offsets = [0, 141], sizes = [2, 256], strides = [1, 1]} : vector<2x512xf32> to vector<2x256xf32>
      %c77 = arith.constant 77 : index
      %60 = memref.load %arg2[%c77] : memref<98xf32, #tpu.memory_space<smem>>
      %61 = vector.broadcast %60 : f32 to vector<2x256xf32>
      %62 = arith.mulf %59, %61 : vector<2x256xf32>
      %63 = arith.addf %53, %58 : vector<2x256xf32>
      %64 = arith.addf %54, %62 : vector<2x256xf32>
      %65 = vector.extract_strided_slice %14 {offsets = [0, 157], sizes = [2, 256], strides = [1, 1]} : vector<2x512xf32> to vector<2x256xf32>
      %c35 = arith.constant 35 : index
      %66 = memref.load %arg2[%c35] : memref<98xf32, #tpu.memory_space<smem>>
      %67 = vector.broadcast %66 : f32 to vector<2x256xf32>
      %68 = arith.mulf %65, %67 : vector<2x256xf32>
      %69 = vector.extract_strided_slice %15 {offsets = [0, 157], sizes = [2, 256], strides = [1, 1]} : vector<2x512xf32> to vector<2x256xf32>
      %c84 = arith.constant 84 : index
      %70 = memref.load %arg2[%c84] : memref<98xf32, #tpu.memory_space<smem>>
      %71 = vector.broadcast %70 : f32 to vector<2x256xf32>
      %72 = arith.mulf %69, %71 : vector<2x256xf32>
      %73 = arith.addf %63, %68 : vector<2x256xf32>
      %74 = arith.addf %64, %72 : vector<2x256xf32>
      %75 = vector.extract_strided_slice %14 {offsets = [0, 173], sizes = [2, 256], strides = [1, 1]} : vector<2x512xf32> to vector<2x256xf32>
      %c42 = arith.constant 42 : index
      %76 = memref.load %arg2[%c42] : memref<98xf32, #tpu.memory_space<smem>>
      %77 = vector.broadcast %76 : f32 to vector<2x256xf32>
      %78 = arith.mulf %75, %77 : vector<2x256xf32>
      %79 = vector.extract_strided_slice %15 {offsets = [0, 173], sizes = [2, 256], strides = [1, 1]} : vector<2x512xf32> to vector<2x256xf32>
      %c91 = arith.constant 91 : index
      %80 = memref.load %arg2[%c91] : memref<98xf32, #tpu.memory_space<smem>>
      %81 = vector.broadcast %80 : f32 to vector<2x256xf32>
      %82 = arith.mulf %79, %81 : vector<2x256xf32>
      %83 = arith.addf %73, %78 : vector<2x256xf32>
      %84 = arith.addf %74, %82 : vector<2x256xf32>
      %85 = arith.addf %83, %84 : vector<2x256xf32>
      %c3_i32 = arith.constant 3 : i32
      %86 = vector.broadcast %c3_i32 : i32 to vector<1x256xi32>
      %87 = arith.cmpi sge, %16, %86 : vector<1x256xi32>
      %c19_i32 = arith.constant 19 : i32
      %88 = vector.broadcast %c19_i32 : i32 to vector<1x256xi32>
      %89 = arith.cmpi slt, %16, %88 : vector<1x256xi32>
      %90 = arith.andi %87, %89 : vector<1x256xi1>
      %cst_16 = arith.constant 0.000000e+00 : f32
      %91 = vector.shape_cast %90 : vector<1x256xi1> to vector<1x256xi1>
      %92 = vector.broadcast %91 : vector<1x256xi1> to vector<2x256xi1>
      %93 = vector.broadcast %cst_16 : f32 to vector<2x256xf32>
      %94 = arith.select %92, %85, %93 : vector<2x256xi1>, vector<2x256xf32>
      %95 = vector.extract_strided_slice %14 {offsets = [0, 78], sizes = [2, 256], strides = [1, 1]} : vector<2x512xf32> to vector<2x256xf32>
      %c1 = arith.constant 1 : index
      %96 = memref.load %arg2[%c1] : memref<98xf32, #tpu.memory_space<smem>>
      %97 = vector.broadcast %96 : f32 to vector<2x256xf32>
      %98 = arith.mulf %95, %97 : vector<2x256xf32>
      %99 = vector.extract_strided_slice %15 {offsets = [0, 78], sizes = [2, 256], strides = [1, 1]} : vector<2x512xf32> to vector<2x256xf32>
      %c50 = arith.constant 50 : index
      %100 = memref.load %arg2[%c50] : memref<98xf32, #tpu.memory_space<smem>>
      %101 = vector.broadcast %100 : f32 to vector<2x256xf32>
      %102 = arith.mulf %99, %101 : vector<2x256xf32>
      %103 = vector.extract_strided_slice %14 {offsets = [0, 94], sizes = [2, 256], strides = [1, 1]} : vector<2x512xf32> to vector<2x256xf32>
      %c8 = arith.constant 8 : index
      %104 = memref.load %arg2[%c8] : memref<98xf32, #tpu.memory_space<smem>>
      %105 = vector.broadcast %104 : f32 to vector<2x256xf32>
      %106 = arith.mulf %103, %105 : vector<2x256xf32>
      %107 = vector.extract_strided_slice %15 {offsets = [0, 94], sizes = [2, 256], strides = [1, 1]} : vector<2x512xf32> to vector<2x256xf32>
      %c57 = arith.constant 57 : index
      %108 = memref.load %arg2[%c57] : memref<98xf32, #tpu.memory_space<smem>>
      %109 = vector.broadcast %108 : f32 to vector<2x256xf32>
      %110 = arith.mulf %107, %109 : vector<2x256xf32>
      %111 = arith.addf %98, %106 : vector<2x256xf32>
      %112 = arith.addf %102, %110 : vector<2x256xf32>
      %113 = vector.extract_strided_slice %14 {offsets = [0, 110], sizes = [2, 256], strides = [1, 1]} : vector<2x512xf32> to vector<2x256xf32>
      %c15 = arith.constant 15 : index
      %114 = memref.load %arg2[%c15] : memref<98xf32, #tpu.memory_space<smem>>
      %115 = vector.broadcast %114 : f32 to vector<2x256xf32>
      %116 = arith.mulf %113, %115 : vector<2x256xf32>
      %117 = vector.extract_strided_slice %15 {offsets = [0, 110], sizes = [2, 256], strides = [1, 1]} : vector<2x512xf32> to vector<2x256xf32>
      %c64 = arith.constant 64 : index
      %118 = memref.load %arg2[%c64] : memref<98xf32, #tpu.memory_space<smem>>
      %119 = vector.broadcast %118 : f32 to vector<2x256xf32>
      %120 = arith.mulf %117, %119 : vector<2x256xf32>
      %121 = arith.addf %111, %116 : vector<2x256xf32>
      %122 = arith.addf %112, %120 : vector<2x256xf32>
      %123 = vector.extract_strided_slice %14 {offsets = [0, 126], sizes = [2, 256], strides = [1, 1]} : vector<2x512xf32> to vector<2x256xf32>
      %c22 = arith.constant 22 : index
      %124 = memref.load %arg2[%c22] : memref<98xf32, #tpu.memory_space<smem>>
      %125 = vector.broadcast %124 : f32 to vector<2x256xf32>
      %126 = arith.mulf %123, %125 : vector<2x256xf32>
      %127 = vector.extract_strided_slice %15 {offsets = [0, 126], sizes = [2, 256], strides = [1, 1]} : vector<2x512xf32> to vector<2x256xf32>
      %c71 = arith.constant 71 : index
      %128 = memref.load %arg2[%c71] : memref<98xf32, #tpu.memory_space<smem>>
      %129 = vector.broadcast %128 : f32 to vector<2x256xf32>
      %130 = arith.mulf %127, %129 : vector<2x256xf32>
      %131 = arith.addf %121, %126 : vector<2x256xf32>
      %132 = arith.addf %122, %130 : vector<2x256xf32>
      %133 = vector.extract_strided_slice %14 {offsets = [0, 142], sizes = [2, 256], strides = [1, 1]} : vector<2x512xf32> to vector<2x256xf32>
      %c29 = arith.constant 29 : index
      %134 = memref.load %arg2[%c29] : memref<98xf32, #tpu.memory_space<smem>>
      %135 = vector.broadcast %134 : f32 to vector<2x256xf32>
      %136 = arith.mulf %133, %135 : vector<2x256xf32>
      %137 = vector.extract_strided_slice %15 {offsets = [0, 142], sizes = [2, 256], strides = [1, 1]} : vector<2x512xf32> to vector<2x256xf32>
      %c78 = arith.constant 78 : index
      %138 = memref.load %arg2[%c78] : memref<98xf32, #tpu.memory_space<smem>>
      %139 = vector.broadcast %138 : f32 to vector<2x256xf32>
      %140 = arith.mulf %137, %139 : vector<2x256xf32>
      %141 = arith.addf %131, %136 : vector<2x256xf32>
      %142 = arith.addf %132, %140 : vector<2x256xf32>
      %143 = vector.extract_strided_slice %14 {offsets = [0, 158], sizes = [2, 256], strides = [1, 1]} : vector<2x512xf32> to vector<2x256xf32>
      %c36 = arith.constant 36 : index
      %144 = memref.load %arg2[%c36] : memref<98xf32, #tpu.memory_space<smem>>
      %145 = vector.broadcast %144 : f32 to vector<2x256xf32>
      %146 = arith.mulf %143, %145 : vector<2x256xf32>
      %147 = vector.extract_strided_slice %15 {offsets = [0, 158], sizes = [2, 256], strides = [1, 1]} : vector<2x512xf32> to vector<2x256xf32>
      %c85 = arith.constant 85 : index
      %148 = memref.load %arg2[%c85] : memref<98xf32, #tpu.memory_space<smem>>
      %149 = vector.broadcast %148 : f32 to vector<2x256xf32>
      %150 = arith.mulf %147, %149 : vector<2x256xf32>
      %151 = arith.addf %141, %146 : vector<2x256xf32>
      %152 = arith.addf %142, %150 : vector<2x256xf32>
      %153 = vector.extract_strided_slice %14 {offsets = [0, 174], sizes = [2, 256], strides = [1, 1]} : vector<2x512xf32> to vector<2x256xf32>
      %c43 = arith.constant 43 : index
      %154 = memref.load %arg2[%c43] : memref<98xf32, #tpu.memory_space<smem>>
      %155 = vector.broadcast %154 : f32 to vector<2x256xf32>
      %156 = arith.mulf %153, %155 : vector<2x256xf32>
      %157 = vector.extract_strided_slice %15 {offsets = [0, 174], sizes = [2, 256], strides = [1, 1]} : vector<2x512xf32> to vector<2x256xf32>
      %c92 = arith.constant 92 : index
      %158 = memref.load %arg2[%c92] : memref<98xf32, #tpu.memory_space<smem>>
      %159 = vector.broadcast %158 : f32 to vector<2x256xf32>
      %160 = arith.mulf %157, %159 : vector<2x256xf32>
      %161 = arith.addf %151, %156 : vector<2x256xf32>
      %162 = arith.addf %152, %160 : vector<2x256xf32>
      %163 = arith.addf %161, %162 : vector<2x256xf32>
      %c2_i32 = arith.constant 2 : i32
      %164 = vector.broadcast %c2_i32 : i32 to vector<1x256xi32>
      %165 = arith.cmpi sge, %16, %164 : vector<1x256xi32>
      %c18_i32 = arith.constant 18 : i32
      %166 = vector.broadcast %c18_i32 : i32 to vector<1x256xi32>
      %167 = arith.cmpi slt, %16, %166 : vector<1x256xi32>
      %168 = arith.andi %165, %167 : vector<1x256xi1>
      %cst_17 = arith.constant 0.000000e+00 : f32
      %169 = vector.shape_cast %168 : vector<1x256xi1> to vector<1x256xi1>
      %170 = vector.broadcast %169 : vector<1x256xi1> to vector<2x256xi1>
      %171 = vector.broadcast %cst_17 : f32 to vector<2x256xf32>
      %172 = arith.select %170, %163, %171 : vector<2x256xi1>, vector<2x256xf32>
      %173 = arith.addf %94, %172 : vector<2x256xf32>
      %174 = vector.extract_strided_slice %14 {offsets = [0, 79], sizes = [2, 256], strides = [1, 1]} : vector<2x512xf32> to vector<2x256xf32>
      %c2 = arith.constant 2 : index
      %175 = memref.load %arg2[%c2] : memref<98xf32, #tpu.memory_space<smem>>
      %176 = vector.broadcast %175 : f32 to vector<2x256xf32>
      %177 = arith.mulf %174, %176 : vector<2x256xf32>
      %178 = vector.extract_strided_slice %15 {offsets = [0, 79], sizes = [2, 256], strides = [1, 1]} : vector<2x512xf32> to vector<2x256xf32>
      %c51 = arith.constant 51 : index
      %179 = memref.load %arg2[%c51] : memref<98xf32, #tpu.memory_space<smem>>
      %180 = vector.broadcast %179 : f32 to vector<2x256xf32>
      %181 = arith.mulf %178, %180 : vector<2x256xf32>
      %182 = vector.extract_strided_slice %14 {offsets = [0, 95], sizes = [2, 256], strides = [1, 1]} : vector<2x512xf32> to vector<2x256xf32>
      %c9 = arith.constant 9 : index
      %183 = memref.load %arg2[%c9] : memref<98xf32, #tpu.memory_space<smem>>
      %184 = vector.broadcast %183 : f32 to vector<2x256xf32>
      %185 = arith.mulf %182, %184 : vector<2x256xf32>
      %186 = vector.extract_strided_slice %15 {offsets = [0, 95], sizes = [2, 256], strides = [1, 1]} : vector<2x512xf32> to vector<2x256xf32>
      %c58 = arith.constant 58 : index
      %187 = memref.load %arg2[%c58] : memref<98xf32, #tpu.memory_space<smem>>
      %188 = vector.broadcast %187 : f32 to vector<2x256xf32>
      %189 = arith.mulf %186, %188 : vector<2x256xf32>
      %190 = arith.addf %177, %185 : vector<2x256xf32>
      %191 = arith.addf %181, %189 : vector<2x256xf32>
      %192 = vector.extract_strided_slice %14 {offsets = [0, 111], sizes = [2, 256], strides = [1, 1]} : vector<2x512xf32> to vector<2x256xf32>
      %c16 = arith.constant 16 : index
      %193 = memref.load %arg2[%c16] : memref<98xf32, #tpu.memory_space<smem>>
      %194 = vector.broadcast %193 : f32 to vector<2x256xf32>
      %195 = arith.mulf %192, %194 : vector<2x256xf32>
      %196 = vector.extract_strided_slice %15 {offsets = [0, 111], sizes = [2, 256], strides = [1, 1]} : vector<2x512xf32> to vector<2x256xf32>
      %c65 = arith.constant 65 : index
      %197 = memref.load %arg2[%c65] : memref<98xf32, #tpu.memory_space<smem>>
      %198 = vector.broadcast %197 : f32 to vector<2x256xf32>
      %199 = arith.mulf %196, %198 : vector<2x256xf32>
      %200 = arith.addf %190, %195 : vector<2x256xf32>
      %201 = arith.addf %191, %199 : vector<2x256xf32>
      %202 = vector.extract_strided_slice %14 {offsets = [0, 127], sizes = [2, 256], strides = [1, 1]} : vector<2x512xf32> to vector<2x256xf32>
      %c23 = arith.constant 23 : index
      %203 = memref.load %arg2[%c23] : memref<98xf32, #tpu.memory_space<smem>>
      %204 = vector.broadcast %203 : f32 to vector<2x256xf32>
      %205 = arith.mulf %202, %204 : vector<2x256xf32>
      %206 = vector.extract_strided_slice %15 {offsets = [0, 127], sizes = [2, 256], strides = [1, 1]} : vector<2x512xf32> to vector<2x256xf32>
      %c72 = arith.constant 72 : index
      %207 = memref.load %arg2[%c72] : memref<98xf32, #tpu.memory_space<smem>>
      %208 = vector.broadcast %207 : f32 to vector<2x256xf32>
      %209 = arith.mulf %206, %208 : vector<2x256xf32>
      %210 = arith.addf %200, %205 : vector<2x256xf32>
      %211 = arith.addf %201, %209 : vector<2x256xf32>
      %212 = vector.extract_strided_slice %14 {offsets = [0, 143], sizes = [2, 256], strides = [1, 1]} : vector<2x512xf32> to vector<2x256xf32>
      %c30 = arith.constant 30 : index
      %213 = memref.load %arg2[%c30] : memref<98xf32, #tpu.memory_space<smem>>
      %214 = vector.broadcast %213 : f32 to vector<2x256xf32>
      %215 = arith.mulf %212, %214 : vector<2x256xf32>
      %216 = vector.extract_strided_slice %15 {offsets = [0, 143], sizes = [2, 256], strides = [1, 1]} : vector<2x512xf32> to vector<2x256xf32>
      %c79 = arith.constant 79 : index
      %217 = memref.load %arg2[%c79] : memref<98xf32, #tpu.memory_space<smem>>
      %218 = vector.broadcast %217 : f32 to vector<2x256xf32>
      %219 = arith.mulf %216, %218 : vector<2x256xf32>
      %220 = arith.addf %210, %215 : vector<2x256xf32>
      %221 = arith.addf %211, %219 : vector<2x256xf32>
      %222 = vector.extract_strided_slice %14 {offsets = [0, 159], sizes = [2, 256], strides = [1, 1]} : vector<2x512xf32> to vector<2x256xf32>
      %c37 = arith.constant 37 : index
      %223 = memref.load %arg2[%c37] : memref<98xf32, #tpu.memory_space<smem>>
      %224 = vector.broadcast %223 : f32 to vector<2x256xf32>
      %225 = arith.mulf %222, %224 : vector<2x256xf32>
      %226 = vector.extract_strided_slice %15 {offsets = [0, 159], sizes = [2, 256], strides = [1, 1]} : vector<2x512xf32> to vector<2x256xf32>
      %c86 = arith.constant 86 : index
      %227 = memref.load %arg2[%c86] : memref<98xf32, #tpu.memory_space<smem>>
      %228 = vector.broadcast %227 : f32 to vector<2x256xf32>
      %229 = arith.mulf %226, %228 : vector<2x256xf32>
      %230 = arith.addf %220, %225 : vector<2x256xf32>
      %231 = arith.addf %221, %229 : vector<2x256xf32>
      %232 = vector.extract_strided_slice %14 {offsets = [0, 175], sizes = [2, 256], strides = [1, 1]} : vector<2x512xf32> to vector<2x256xf32>
      %c44 = arith.constant 44 : index
      %233 = memref.load %arg2[%c44] : memref<98xf32, #tpu.memory_space<smem>>
      %234 = vector.broadcast %233 : f32 to vector<2x256xf32>
      %235 = arith.mulf %232, %234 : vector<2x256xf32>
      %236 = vector.extract_strided_slice %15 {offsets = [0, 175], sizes = [2, 256], strides = [1, 1]} : vector<2x512xf32> to vector<2x256xf32>
      %c93 = arith.constant 93 : index
      %237 = memref.load %arg2[%c93] : memref<98xf32, #tpu.memory_space<smem>>
      %238 = vector.broadcast %237 : f32 to vector<2x256xf32>
      %239 = arith.mulf %236, %238 : vector<2x256xf32>
      %240 = arith.addf %230, %235 : vector<2x256xf32>
      %241 = arith.addf %231, %239 : vector<2x256xf32>
      %242 = arith.addf %240, %241 : vector<2x256xf32>
      %c1_i32 = arith.constant 1 : i32
      %243 = vector.broadcast %c1_i32 : i32 to vector<1x256xi32>
      %244 = arith.cmpi sge, %16, %243 : vector<1x256xi32>
      %c17_i32 = arith.constant 17 : i32
      %245 = vector.broadcast %c17_i32 : i32 to vector<1x256xi32>
      %246 = arith.cmpi slt, %16, %245 : vector<1x256xi32>
      %247 = arith.andi %244, %246 : vector<1x256xi1>
      %cst_18 = arith.constant 0.000000e+00 : f32
      %248 = vector.shape_cast %247 : vector<1x256xi1> to vector<1x256xi1>
      %249 = vector.broadcast %248 : vector<1x256xi1> to vector<2x256xi1>
      %250 = vector.broadcast %cst_18 : f32 to vector<2x256xf32>
      %251 = arith.select %249, %242, %250 : vector<2x256xi1>, vector<2x256xf32>
      %252 = arith.addf %173, %251 : vector<2x256xf32>
      %253 = vector.extract_strided_slice %14 {offsets = [0, 80], sizes = [2, 256], strides = [1, 1]} : vector<2x512xf32> to vector<2x256xf32>
      %c3 = arith.constant 3 : index
      %254 = memref.load %arg2[%c3] : memref<98xf32, #tpu.memory_space<smem>>
      %255 = vector.broadcast %254 : f32 to vector<2x256xf32>
      %256 = arith.mulf %253, %255 : vector<2x256xf32>
      %257 = vector.extract_strided_slice %15 {offsets = [0, 80], sizes = [2, 256], strides = [1, 1]} : vector<2x512xf32> to vector<2x256xf32>
      %c52 = arith.constant 52 : index
      %258 = memref.load %arg2[%c52] : memref<98xf32, #tpu.memory_space<smem>>
      %259 = vector.broadcast %258 : f32 to vector<2x256xf32>
      %260 = arith.mulf %257, %259 : vector<2x256xf32>
      %261 = vector.extract_strided_slice %14 {offsets = [0, 96], sizes = [2, 256], strides = [1, 1]} : vector<2x512xf32> to vector<2x256xf32>
      %c10 = arith.constant 10 : index
      %262 = memref.load %arg2[%c10] : memref<98xf32, #tpu.memory_space<smem>>
      %263 = vector.broadcast %262 : f32 to vector<2x256xf32>
      %264 = arith.mulf %261, %263 : vector<2x256xf32>
      %265 = vector.extract_strided_slice %15 {offsets = [0, 96], sizes = [2, 256], strides = [1, 1]} : vector<2x512xf32> to vector<2x256xf32>
      %c59 = arith.constant 59 : index
      %266 = memref.load %arg2[%c59] : memref<98xf32, #tpu.memory_space<smem>>
      %267 = vector.broadcast %266 : f32 to vector<2x256xf32>
      %268 = arith.mulf %265, %267 : vector<2x256xf32>
      %269 = arith.addf %256, %264 : vector<2x256xf32>
      %270 = arith.addf %260, %268 : vector<2x256xf32>
      %271 = vector.extract_strided_slice %14 {offsets = [0, 112], sizes = [2, 256], strides = [1, 1]} : vector<2x512xf32> to vector<2x256xf32>
      %c17 = arith.constant 17 : index
      %272 = memref.load %arg2[%c17] : memref<98xf32, #tpu.memory_space<smem>>
      %273 = vector.broadcast %272 : f32 to vector<2x256xf32>
      %274 = arith.mulf %271, %273 : vector<2x256xf32>
      %275 = vector.extract_strided_slice %15 {offsets = [0, 112], sizes = [2, 256], strides = [1, 1]} : vector<2x512xf32> to vector<2x256xf32>
      %c66 = arith.constant 66 : index
      %276 = memref.load %arg2[%c66] : memref<98xf32, #tpu.memory_space<smem>>
      %277 = vector.broadcast %276 : f32 to vector<2x256xf32>
      %278 = arith.mulf %275, %277 : vector<2x256xf32>
      %279 = arith.addf %269, %274 : vector<2x256xf32>
      %280 = arith.addf %270, %278 : vector<2x256xf32>
      %281 = vector.extract_strided_slice %14 {offsets = [0, 128], sizes = [2, 256], strides = [1, 1]} : vector<2x512xf32> to vector<2x256xf32>
      %c24 = arith.constant 24 : index
      %282 = memref.load %arg2[%c24] : memref<98xf32, #tpu.memory_space<smem>>
      %283 = vector.broadcast %282 : f32 to vector<2x256xf32>
      %284 = arith.mulf %281, %283 : vector<2x256xf32>
      %285 = vector.extract_strided_slice %15 {offsets = [0, 128], sizes = [2, 256], strides = [1, 1]} : vector<2x512xf32> to vector<2x256xf32>
      %c73 = arith.constant 73 : index
      %286 = memref.load %arg2[%c73] : memref<98xf32, #tpu.memory_space<smem>>
      %287 = vector.broadcast %286 : f32 to vector<2x256xf32>
      %288 = arith.mulf %285, %287 : vector<2x256xf32>
      %289 = arith.addf %279, %284 : vector<2x256xf32>
      %290 = arith.addf %280, %288 : vector<2x256xf32>
      %291 = vector.extract_strided_slice %14 {offsets = [0, 144], sizes = [2, 256], strides = [1, 1]} : vector<2x512xf32> to vector<2x256xf32>
      %c31 = arith.constant 31 : index
      %292 = memref.load %arg2[%c31] : memref<98xf32, #tpu.memory_space<smem>>
      %293 = vector.broadcast %292 : f32 to vector<2x256xf32>
      %294 = arith.mulf %291, %293 : vector<2x256xf32>
      %295 = vector.extract_strided_slice %15 {offsets = [0, 144], sizes = [2, 256], strides = [1, 1]} : vector<2x512xf32> to vector<2x256xf32>
      %c80 = arith.constant 80 : index
      %296 = memref.load %arg2[%c80] : memref<98xf32, #tpu.memory_space<smem>>
      %297 = vector.broadcast %296 : f32 to vector<2x256xf32>
      %298 = arith.mulf %295, %297 : vector<2x256xf32>
      %299 = arith.addf %289, %294 : vector<2x256xf32>
      %300 = arith.addf %290, %298 : vector<2x256xf32>
      %301 = vector.extract_strided_slice %14 {offsets = [0, 160], sizes = [2, 256], strides = [1, 1]} : vector<2x512xf32> to vector<2x256xf32>
      %c38 = arith.constant 38 : index
      %302 = memref.load %arg2[%c38] : memref<98xf32, #tpu.memory_space<smem>>
      %303 = vector.broadcast %302 : f32 to vector<2x256xf32>
      %304 = arith.mulf %301, %303 : vector<2x256xf32>
      %305 = vector.extract_strided_slice %15 {offsets = [0, 160], sizes = [2, 256], strides = [1, 1]} : vector<2x512xf32> to vector<2x256xf32>
      %c87 = arith.constant 87 : index
      %306 = memref.load %arg2[%c87] : memref<98xf32, #tpu.memory_space<smem>>
      %307 = vector.broadcast %306 : f32 to vector<2x256xf32>
      %308 = arith.mulf %305, %307 : vector<2x256xf32>
      %309 = arith.addf %299, %304 : vector<2x256xf32>
      %310 = arith.addf %300, %308 : vector<2x256xf32>
      %311 = vector.extract_strided_slice %14 {offsets = [0, 176], sizes = [2, 256], strides = [1, 1]} : vector<2x512xf32> to vector<2x256xf32>
      %c45 = arith.constant 45 : index
      %312 = memref.load %arg2[%c45] : memref<98xf32, #tpu.memory_space<smem>>
      %313 = vector.broadcast %312 : f32 to vector<2x256xf32>
      %314 = arith.mulf %311, %313 : vector<2x256xf32>
      %315 = vector.extract_strided_slice %15 {offsets = [0, 176], sizes = [2, 256], strides = [1, 1]} : vector<2x512xf32> to vector<2x256xf32>
      %c94 = arith.constant 94 : index
      %316 = memref.load %arg2[%c94] : memref<98xf32, #tpu.memory_space<smem>>
      %317 = vector.broadcast %316 : f32 to vector<2x256xf32>
      %318 = arith.mulf %315, %317 : vector<2x256xf32>
      %319 = arith.addf %309, %314 : vector<2x256xf32>
      %320 = arith.addf %310, %318 : vector<2x256xf32>
      %321 = arith.addf %319, %320 : vector<2x256xf32>
      %322 = arith.addf %252, %321 : vector<2x256xf32>
      %323 = vector.extract_strided_slice %14 {offsets = [0, 81], sizes = [2, 256], strides = [1, 1]} : vector<2x512xf32> to vector<2x256xf32>
      %c4 = arith.constant 4 : index
      %324 = memref.load %arg2[%c4] : memref<98xf32, #tpu.memory_space<smem>>
      %325 = vector.broadcast %324 : f32 to vector<2x256xf32>
      %326 = arith.mulf %323, %325 : vector<2x256xf32>
      %327 = vector.extract_strided_slice %15 {offsets = [0, 81], sizes = [2, 256], strides = [1, 1]} : vector<2x512xf32> to vector<2x256xf32>
      %c53 = arith.constant 53 : index
      %328 = memref.load %arg2[%c53] : memref<98xf32, #tpu.memory_space<smem>>
      %329 = vector.broadcast %328 : f32 to vector<2x256xf32>
      %330 = arith.mulf %327, %329 : vector<2x256xf32>
      %331 = vector.extract_strided_slice %14 {offsets = [0, 97], sizes = [2, 256], strides = [1, 1]} : vector<2x512xf32> to vector<2x256xf32>
      %c11 = arith.constant 11 : index
      %332 = memref.load %arg2[%c11] : memref<98xf32, #tpu.memory_space<smem>>
      %333 = vector.broadcast %332 : f32 to vector<2x256xf32>
      %334 = arith.mulf %331, %333 : vector<2x256xf32>
      %335 = vector.extract_strided_slice %15 {offsets = [0, 97], sizes = [2, 256], strides = [1, 1]} : vector<2x512xf32> to vector<2x256xf32>
      %c60 = arith.constant 60 : index
      %336 = memref.load %arg2[%c60] : memref<98xf32, #tpu.memory_space<smem>>
      %337 = vector.broadcast %336 : f32 to vector<2x256xf32>
      %338 = arith.mulf %335, %337 : vector<2x256xf32>
      %339 = arith.addf %326, %334 : vector<2x256xf32>
      %340 = arith.addf %330, %338 : vector<2x256xf32>
      %341 = vector.extract_strided_slice %14 {offsets = [0, 113], sizes = [2, 256], strides = [1, 1]} : vector<2x512xf32> to vector<2x256xf32>
      %c18 = arith.constant 18 : index
      %342 = memref.load %arg2[%c18] : memref<98xf32, #tpu.memory_space<smem>>
      %343 = vector.broadcast %342 : f32 to vector<2x256xf32>
      %344 = arith.mulf %341, %343 : vector<2x256xf32>
      %345 = vector.extract_strided_slice %15 {offsets = [0, 113], sizes = [2, 256], strides = [1, 1]} : vector<2x512xf32> to vector<2x256xf32>
      %c67 = arith.constant 67 : index
      %346 = memref.load %arg2[%c67] : memref<98xf32, #tpu.memory_space<smem>>
      %347 = vector.broadcast %346 : f32 to vector<2x256xf32>
      %348 = arith.mulf %345, %347 : vector<2x256xf32>
      %349 = arith.addf %339, %344 : vector<2x256xf32>
      %350 = arith.addf %340, %348 : vector<2x256xf32>
      %351 = vector.extract_strided_slice %14 {offsets = [0, 129], sizes = [2, 256], strides = [1, 1]} : vector<2x512xf32> to vector<2x256xf32>
      %c25 = arith.constant 25 : index
      %352 = memref.load %arg2[%c25] : memref<98xf32, #tpu.memory_space<smem>>
      %353 = vector.broadcast %352 : f32 to vector<2x256xf32>
      %354 = arith.mulf %351, %353 : vector<2x256xf32>
      %355 = vector.extract_strided_slice %15 {offsets = [0, 129], sizes = [2, 256], strides = [1, 1]} : vector<2x512xf32> to vector<2x256xf32>
      %c74 = arith.constant 74 : index
      %356 = memref.load %arg2[%c74] : memref<98xf32, #tpu.memory_space<smem>>
      %357 = vector.broadcast %356 : f32 to vector<2x256xf32>
      %358 = arith.mulf %355, %357 : vector<2x256xf32>
      %359 = arith.addf %349, %354 : vector<2x256xf32>
      %360 = arith.addf %350, %358 : vector<2x256xf32>
      %361 = vector.extract_strided_slice %14 {offsets = [0, 145], sizes = [2, 256], strides = [1, 1]} : vector<2x512xf32> to vector<2x256xf32>
      %c32 = arith.constant 32 : index
      %362 = memref.load %arg2[%c32] : memref<98xf32, #tpu.memory_space<smem>>
      %363 = vector.broadcast %362 : f32 to vector<2x256xf32>
      %364 = arith.mulf %361, %363 : vector<2x256xf32>
      %365 = vector.extract_strided_slice %15 {offsets = [0, 145], sizes = [2, 256], strides = [1, 1]} : vector<2x512xf32> to vector<2x256xf32>
      %c81 = arith.constant 81 : index
      %366 = memref.load %arg2[%c81] : memref<98xf32, #tpu.memory_space<smem>>
      %367 = vector.broadcast %366 : f32 to vector<2x256xf32>
      %368 = arith.mulf %365, %367 : vector<2x256xf32>
      %369 = arith.addf %359, %364 : vector<2x256xf32>
      %370 = arith.addf %360, %368 : vector<2x256xf32>
      %371 = vector.extract_strided_slice %14 {offsets = [0, 161], sizes = [2, 256], strides = [1, 1]} : vector<2x512xf32> to vector<2x256xf32>
      %c39 = arith.constant 39 : index
      %372 = memref.load %arg2[%c39] : memref<98xf32, #tpu.memory_space<smem>>
      %373 = vector.broadcast %372 : f32 to vector<2x256xf32>
      %374 = arith.mulf %371, %373 : vector<2x256xf32>
      %375 = vector.extract_strided_slice %15 {offsets = [0, 161], sizes = [2, 256], strides = [1, 1]} : vector<2x512xf32> to vector<2x256xf32>
      %c88 = arith.constant 88 : index
      %376 = memref.load %arg2[%c88] : memref<98xf32, #tpu.memory_space<smem>>
      %377 = vector.broadcast %376 : f32 to vector<2x256xf32>
      %378 = arith.mulf %375, %377 : vector<2x256xf32>
      %379 = arith.addf %369, %374 : vector<2x256xf32>
      %380 = arith.addf %370, %378 : vector<2x256xf32>
      %381 = vector.extract_strided_slice %14 {offsets = [0, 177], sizes = [2, 256], strides = [1, 1]} : vector<2x512xf32> to vector<2x256xf32>
      %c46 = arith.constant 46 : index
      %382 = memref.load %arg2[%c46] : memref<98xf32, #tpu.memory_space<smem>>
      %383 = vector.broadcast %382 : f32 to vector<2x256xf32>
      %384 = arith.mulf %381, %383 : vector<2x256xf32>
      %385 = vector.extract_strided_slice %15 {offsets = [0, 177], sizes = [2, 256], strides = [1, 1]} : vector<2x512xf32> to vector<2x256xf32>
      %c95 = arith.constant 95 : index
      %386 = memref.load %arg2[%c95] : memref<98xf32, #tpu.memory_space<smem>>
      %387 = vector.broadcast %386 : f32 to vector<2x256xf32>
      %388 = arith.mulf %385, %387 : vector<2x256xf32>
      %389 = arith.addf %379, %384 : vector<2x256xf32>
      %390 = arith.addf %380, %388 : vector<2x256xf32>
      %391 = arith.addf %389, %390 : vector<2x256xf32>
      %c-1_i32 = arith.constant -1 : i32
      %392 = vector.broadcast %c-1_i32 : i32 to vector<1x256xi32>
      %393 = arith.cmpi sge, %16, %392 : vector<1x256xi32>
      %c15_i32 = arith.constant 15 : i32
      %394 = vector.broadcast %c15_i32 : i32 to vector<1x256xi32>
      %395 = arith.cmpi slt, %16, %394 : vector<1x256xi32>
      %396 = arith.andi %393, %395 : vector<1x256xi1>
      %cst_19 = arith.constant 0.000000e+00 : f32
      %397 = vector.shape_cast %396 : vector<1x256xi1> to vector<1x256xi1>
      %398 = vector.broadcast %397 : vector<1x256xi1> to vector<2x256xi1>
      %399 = vector.broadcast %cst_19 : f32 to vector<2x256xf32>
      %400 = arith.select %398, %391, %399 : vector<2x256xi1>, vector<2x256xf32>
      %401 = arith.addf %322, %400 : vector<2x256xf32>
      %402 = vector.extract_strided_slice %14 {offsets = [0, 82], sizes = [2, 256], strides = [1, 1]} : vector<2x512xf32> to vector<2x256xf32>
      %c5 = arith.constant 5 : index
      %403 = memref.load %arg2[%c5] : memref<98xf32, #tpu.memory_space<smem>>
      %404 = vector.broadcast %403 : f32 to vector<2x256xf32>
      %405 = arith.mulf %402, %404 : vector<2x256xf32>
      %406 = vector.extract_strided_slice %15 {offsets = [0, 82], sizes = [2, 256], strides = [1, 1]} : vector<2x512xf32> to vector<2x256xf32>
      %c54 = arith.constant 54 : index
      %407 = memref.load %arg2[%c54] : memref<98xf32, #tpu.memory_space<smem>>
      %408 = vector.broadcast %407 : f32 to vector<2x256xf32>
      %409 = arith.mulf %406, %408 : vector<2x256xf32>
      %410 = vector.extract_strided_slice %14 {offsets = [0, 98], sizes = [2, 256], strides = [1, 1]} : vector<2x512xf32> to vector<2x256xf32>
      %c12 = arith.constant 12 : index
      %411 = memref.load %arg2[%c12] : memref<98xf32, #tpu.memory_space<smem>>
      %412 = vector.broadcast %411 : f32 to vector<2x256xf32>
      %413 = arith.mulf %410, %412 : vector<2x256xf32>
      %414 = vector.extract_strided_slice %15 {offsets = [0, 98], sizes = [2, 256], strides = [1, 1]} : vector<2x512xf32> to vector<2x256xf32>
      %c61 = arith.constant 61 : index
      %415 = memref.load %arg2[%c61] : memref<98xf32, #tpu.memory_space<smem>>
      %416 = vector.broadcast %415 : f32 to vector<2x256xf32>
      %417 = arith.mulf %414, %416 : vector<2x256xf32>
      %418 = arith.addf %405, %413 : vector<2x256xf32>
      %419 = arith.addf %409, %417 : vector<2x256xf32>
      %420 = vector.extract_strided_slice %14 {offsets = [0, 114], sizes = [2, 256], strides = [1, 1]} : vector<2x512xf32> to vector<2x256xf32>
      %c19 = arith.constant 19 : index
      %421 = memref.load %arg2[%c19] : memref<98xf32, #tpu.memory_space<smem>>
      %422 = vector.broadcast %421 : f32 to vector<2x256xf32>
      %423 = arith.mulf %420, %422 : vector<2x256xf32>
      %424 = vector.extract_strided_slice %15 {offsets = [0, 114], sizes = [2, 256], strides = [1, 1]} : vector<2x512xf32> to vector<2x256xf32>
      %c68 = arith.constant 68 : index
      %425 = memref.load %arg2[%c68] : memref<98xf32, #tpu.memory_space<smem>>
      %426 = vector.broadcast %425 : f32 to vector<2x256xf32>
      %427 = arith.mulf %424, %426 : vector<2x256xf32>
      %428 = arith.addf %418, %423 : vector<2x256xf32>
      %429 = arith.addf %419, %427 : vector<2x256xf32>
      %430 = vector.extract_strided_slice %14 {offsets = [0, 130], sizes = [2, 256], strides = [1, 1]} : vector<2x512xf32> to vector<2x256xf32>
      %c26 = arith.constant 26 : index
      %431 = memref.load %arg2[%c26] : memref<98xf32, #tpu.memory_space<smem>>
      %432 = vector.broadcast %431 : f32 to vector<2x256xf32>
      %433 = arith.mulf %430, %432 : vector<2x256xf32>
      %434 = vector.extract_strided_slice %15 {offsets = [0, 130], sizes = [2, 256], strides = [1, 1]} : vector<2x512xf32> to vector<2x256xf32>
      %c75 = arith.constant 75 : index
      %435 = memref.load %arg2[%c75] : memref<98xf32, #tpu.memory_space<smem>>
      %436 = vector.broadcast %435 : f32 to vector<2x256xf32>
      %437 = arith.mulf %434, %436 : vector<2x256xf32>
      %438 = arith.addf %428, %433 : vector<2x256xf32>
      %439 = arith.addf %429, %437 : vector<2x256xf32>
      %440 = vector.extract_strided_slice %14 {offsets = [0, 146], sizes = [2, 256], strides = [1, 1]} : vector<2x512xf32> to vector<2x256xf32>
      %c33 = arith.constant 33 : index
      %441 = memref.load %arg2[%c33] : memref<98xf32, #tpu.memory_space<smem>>
      %442 = vector.broadcast %441 : f32 to vector<2x256xf32>
      %443 = arith.mulf %440, %442 : vector<2x256xf32>
      %444 = vector.extract_strided_slice %15 {offsets = [0, 146], sizes = [2, 256], strides = [1, 1]} : vector<2x512xf32> to vector<2x256xf32>
      %c82 = arith.constant 82 : index
      %445 = memref.load %arg2[%c82] : memref<98xf32, #tpu.memory_space<smem>>
      %446 = vector.broadcast %445 : f32 to vector<2x256xf32>
      %447 = arith.mulf %444, %446 : vector<2x256xf32>
      %448 = arith.addf %438, %443 : vector<2x256xf32>
      %449 = arith.addf %439, %447 : vector<2x256xf32>
      %450 = vector.extract_strided_slice %14 {offsets = [0, 162], sizes = [2, 256], strides = [1, 1]} : vector<2x512xf32> to vector<2x256xf32>
      %c40 = arith.constant 40 : index
      %451 = memref.load %arg2[%c40] : memref<98xf32, #tpu.memory_space<smem>>
      %452 = vector.broadcast %451 : f32 to vector<2x256xf32>
      %453 = arith.mulf %450, %452 : vector<2x256xf32>
      %454 = vector.extract_strided_slice %15 {offsets = [0, 162], sizes = [2, 256], strides = [1, 1]} : vector<2x512xf32> to vector<2x256xf32>
      %c89 = arith.constant 89 : index
      %455 = memref.load %arg2[%c89] : memref<98xf32, #tpu.memory_space<smem>>
      %456 = vector.broadcast %455 : f32 to vector<2x256xf32>
      %457 = arith.mulf %454, %456 : vector<2x256xf32>
      %458 = arith.addf %448, %453 : vector<2x256xf32>
      %459 = arith.addf %449, %457 : vector<2x256xf32>
      %460 = vector.extract_strided_slice %14 {offsets = [0, 178], sizes = [2, 256], strides = [1, 1]} : vector<2x512xf32> to vector<2x256xf32>
      %c47 = arith.constant 47 : index
      %461 = memref.load %arg2[%c47] : memref<98xf32, #tpu.memory_space<smem>>
      %462 = vector.broadcast %461 : f32 to vector<2x256xf32>
      %463 = arith.mulf %460, %462 : vector<2x256xf32>
      %464 = vector.extract_strided_slice %15 {offsets = [0, 178], sizes = [2, 256], strides = [1, 1]} : vector<2x512xf32> to vector<2x256xf32>
      %c96 = arith.constant 96 : index
      %465 = memref.load %arg2[%c96] : memref<98xf32, #tpu.memory_space<smem>>
      %466 = vector.broadcast %465 : f32 to vector<2x256xf32>
      %467 = arith.mulf %464, %466 : vector<2x256xf32>
      %468 = arith.addf %458, %463 : vector<2x256xf32>
      %469 = arith.addf %459, %467 : vector<2x256xf32>
      %470 = arith.addf %468, %469 : vector<2x256xf32>
      %c-2_i32 = arith.constant -2 : i32
      %471 = vector.broadcast %c-2_i32 : i32 to vector<1x256xi32>
      %472 = arith.cmpi sge, %16, %471 : vector<1x256xi32>
      %c14_i32 = arith.constant 14 : i32
      %473 = vector.broadcast %c14_i32 : i32 to vector<1x256xi32>
      %474 = arith.cmpi slt, %16, %473 : vector<1x256xi32>
      %475 = arith.andi %472, %474 : vector<1x256xi1>
      %cst_20 = arith.constant 0.000000e+00 : f32
      %476 = vector.shape_cast %475 : vector<1x256xi1> to vector<1x256xi1>
      %477 = vector.broadcast %476 : vector<1x256xi1> to vector<2x256xi1>
      %478 = vector.broadcast %cst_20 : f32 to vector<2x256xf32>
      %479 = arith.select %477, %470, %478 : vector<2x256xi1>, vector<2x256xf32>
      %480 = arith.addf %401, %479 : vector<2x256xf32>
      %481 = vector.extract_strided_slice %14 {offsets = [0, 83], sizes = [2, 256], strides = [1, 1]} : vector<2x512xf32> to vector<2x256xf32>
      %c6 = arith.constant 6 : index
      %482 = memref.load %arg2[%c6] : memref<98xf32, #tpu.memory_space<smem>>
      %483 = vector.broadcast %482 : f32 to vector<2x256xf32>
      %484 = arith.mulf %481, %483 : vector<2x256xf32>
      %485 = vector.extract_strided_slice %15 {offsets = [0, 83], sizes = [2, 256], strides = [1, 1]} : vector<2x512xf32> to vector<2x256xf32>
      %c55 = arith.constant 55 : index
      %486 = memref.load %arg2[%c55] : memref<98xf32, #tpu.memory_space<smem>>
      %487 = vector.broadcast %486 : f32 to vector<2x256xf32>
      %488 = arith.mulf %485, %487 : vector<2x256xf32>
      %489 = vector.extract_strided_slice %14 {offsets = [0, 99], sizes = [2, 256], strides = [1, 1]} : vector<2x512xf32> to vector<2x256xf32>
      %c13 = arith.constant 13 : index
      %490 = memref.load %arg2[%c13] : memref<98xf32, #tpu.memory_space<smem>>
      %491 = vector.broadcast %490 : f32 to vector<2x256xf32>
      %492 = arith.mulf %489, %491 : vector<2x256xf32>
      %493 = vector.extract_strided_slice %15 {offsets = [0, 99], sizes = [2, 256], strides = [1, 1]} : vector<2x512xf32> to vector<2x256xf32>
      %c62 = arith.constant 62 : index
      %494 = memref.load %arg2[%c62] : memref<98xf32, #tpu.memory_space<smem>>
      %495 = vector.broadcast %494 : f32 to vector<2x256xf32>
      %496 = arith.mulf %493, %495 : vector<2x256xf32>
      %497 = arith.addf %484, %492 : vector<2x256xf32>
      %498 = arith.addf %488, %496 : vector<2x256xf32>
      %499 = vector.extract_strided_slice %14 {offsets = [0, 115], sizes = [2, 256], strides = [1, 1]} : vector<2x512xf32> to vector<2x256xf32>
      %c20 = arith.constant 20 : index
      %500 = memref.load %arg2[%c20] : memref<98xf32, #tpu.memory_space<smem>>
      %501 = vector.broadcast %500 : f32 to vector<2x256xf32>
      %502 = arith.mulf %499, %501 : vector<2x256xf32>
      %503 = vector.extract_strided_slice %15 {offsets = [0, 115], sizes = [2, 256], strides = [1, 1]} : vector<2x512xf32> to vector<2x256xf32>
      %c69 = arith.constant 69 : index
      %504 = memref.load %arg2[%c69] : memref<98xf32, #tpu.memory_space<smem>>
      %505 = vector.broadcast %504 : f32 to vector<2x256xf32>
      %506 = arith.mulf %503, %505 : vector<2x256xf32>
      %507 = arith.addf %497, %502 : vector<2x256xf32>
      %508 = arith.addf %498, %506 : vector<2x256xf32>
      %509 = vector.extract_strided_slice %14 {offsets = [0, 131], sizes = [2, 256], strides = [1, 1]} : vector<2x512xf32> to vector<2x256xf32>
      %c27 = arith.constant 27 : index
      %510 = memref.load %arg2[%c27] : memref<98xf32, #tpu.memory_space<smem>>
      %511 = vector.broadcast %510 : f32 to vector<2x256xf32>
      %512 = arith.mulf %509, %511 : vector<2x256xf32>
      %513 = vector.extract_strided_slice %15 {offsets = [0, 131], sizes = [2, 256], strides = [1, 1]} : vector<2x512xf32> to vector<2x256xf32>
      %c76 = arith.constant 76 : index
      %514 = memref.load %arg2[%c76] : memref<98xf32, #tpu.memory_space<smem>>
      %515 = vector.broadcast %514 : f32 to vector<2x256xf32>
      %516 = arith.mulf %513, %515 : vector<2x256xf32>
      %517 = arith.addf %507, %512 : vector<2x256xf32>
      %518 = arith.addf %508, %516 : vector<2x256xf32>
      %519 = vector.extract_strided_slice %14 {offsets = [0, 147], sizes = [2, 256], strides = [1, 1]} : vector<2x512xf32> to vector<2x256xf32>
      %c34 = arith.constant 34 : index
      %520 = memref.load %arg2[%c34] : memref<98xf32, #tpu.memory_space<smem>>
      %521 = vector.broadcast %520 : f32 to vector<2x256xf32>
      %522 = arith.mulf %519, %521 : vector<2x256xf32>
      %523 = vector.extract_strided_slice %15 {offsets = [0, 147], sizes = [2, 256], strides = [1, 1]} : vector<2x512xf32> to vector<2x256xf32>
      %c83 = arith.constant 83 : index
      %524 = memref.load %arg2[%c83] : memref<98xf32, #tpu.memory_space<smem>>
      %525 = vector.broadcast %524 : f32 to vector<2x256xf32>
      %526 = arith.mulf %523, %525 : vector<2x256xf32>
      %527 = arith.addf %517, %522 : vector<2x256xf32>
      %528 = arith.addf %518, %526 : vector<2x256xf32>
      %529 = vector.extract_strided_slice %14 {offsets = [0, 163], sizes = [2, 256], strides = [1, 1]} : vector<2x512xf32> to vector<2x256xf32>
      %c41 = arith.constant 41 : index
      %530 = memref.load %arg2[%c41] : memref<98xf32, #tpu.memory_space<smem>>
      %531 = vector.broadcast %530 : f32 to vector<2x256xf32>
      %532 = arith.mulf %529, %531 : vector<2x256xf32>
      %533 = vector.extract_strided_slice %15 {offsets = [0, 163], sizes = [2, 256], strides = [1, 1]} : vector<2x512xf32> to vector<2x256xf32>
      %c90 = arith.constant 90 : index
      %534 = memref.load %arg2[%c90] : memref<98xf32, #tpu.memory_space<smem>>
      %535 = vector.broadcast %534 : f32 to vector<2x256xf32>
      %536 = arith.mulf %533, %535 : vector<2x256xf32>
      %537 = arith.addf %527, %532 : vector<2x256xf32>
      %538 = arith.addf %528, %536 : vector<2x256xf32>
      %539 = vector.extract_strided_slice %14 {offsets = [0, 179], sizes = [2, 256], strides = [1, 1]} : vector<2x512xf32> to vector<2x256xf32>
      %c48 = arith.constant 48 : index
      %540 = memref.load %arg2[%c48] : memref<98xf32, #tpu.memory_space<smem>>
      %541 = vector.broadcast %540 : f32 to vector<2x256xf32>
      %542 = arith.mulf %539, %541 : vector<2x256xf32>
      %543 = vector.extract_strided_slice %15 {offsets = [0, 179], sizes = [2, 256], strides = [1, 1]} : vector<2x512xf32> to vector<2x256xf32>
      %c97 = arith.constant 97 : index
      %544 = memref.load %arg2[%c97] : memref<98xf32, #tpu.memory_space<smem>>
      %545 = vector.broadcast %544 : f32 to vector<2x256xf32>
      %546 = arith.mulf %543, %545 : vector<2x256xf32>
      %547 = arith.addf %537, %542 : vector<2x256xf32>
      %548 = arith.addf %538, %546 : vector<2x256xf32>
      %549 = arith.addf %547, %548 : vector<2x256xf32>
      %c-3_i32 = arith.constant -3 : i32
      %550 = vector.broadcast %c-3_i32 : i32 to vector<1x256xi32>
      %551 = arith.cmpi sge, %16, %550 : vector<1x256xi32>
      %c13_i32 = arith.constant 13 : i32
      %552 = vector.broadcast %c13_i32 : i32 to vector<1x256xi32>
      %553 = arith.cmpi slt, %16, %552 : vector<1x256xi32>
      %554 = arith.andi %551, %553 : vector<1x256xi1>
      %cst_21 = arith.constant 0.000000e+00 : f32
      %555 = vector.shape_cast %554 : vector<1x256xi1> to vector<1x256xi1>
      %556 = vector.broadcast %555 : vector<1x256xi1> to vector<2x256xi1>
      %557 = vector.broadcast %cst_21 : f32 to vector<2x256xf32>
      %558 = arith.select %556, %549, %557 : vector<2x256xi1>, vector<2x256xf32>
      %559 = arith.addf %480, %558 : vector<2x256xf32>
      %560 = arith.negf %559 : vector<2x256xf32>
      %561 = math.exp %560 : vector<2x256xf32>
      %cst_22 = arith.constant 1.000000e+00 : f32
      %562 = vector.broadcast %cst_22 : f32 to vector<2x256xf32>
      %563 = arith.addf %562, %561 : vector<2x256xf32>
      %564 = arith.divf %562, %563 : vector<2x256xf32>
      %c0_23 = arith.constant 0 : index
      %c0_24 = arith.constant 0 : index
      %565 = vector.load %arg5[%c0_23, %c0_24] : memref<2x256xf32, #tpu.memory_space<vmem>>, vector<2x256xf32>
      tpu.vector_store %arg5[%c0_23, %c0_24], %564 {strides = array<i32>} : memref<2x256xf32, #tpu.memory_space<vmem>>, vector<2x256xf32>,
    } else {
    }
    return
  }
  func.func @transform_0(%arg0: i32, %arg1: i32) -> i32 {
    %c0_i32 = arith.constant 0 : i32
    %c0_i32_0 = arith.constant 0 : i32
    return %c0_i32 : i32
  }
  func.func @transform_1(%arg0: i32, %arg1: i32) -> (i32, i32) {
    %c0_i32 = arith.constant 0 : i32
    %c0_i32_0 = arith.constant 0 : i32
    %c0_i32_1 = arith.constant 0 : i32
    return %c0_i32, %c0_i32_0 : i32, i32
  }
  func.func @transform_2(%arg0: i32, %arg1: i32) -> (i32, i32, i32) {
    %c0_i32 = arith.constant 0 : i32
    %c0_i32_0 = arith.constant 0 : i32
    return %arg0, %arg1, %c0_i32 : i32, i32, i32
  }
  func.func @transform_3(%arg0: i32, %arg1: i32) -> (i32, i32) {
    %c0_i32 = arith.constant 0 : i32
    %c0_i32_0 = arith.constant 0 : i32
    return %arg0, %c0_i32 : i32, i32
  }
}

</mosaic_0001>

<bundles_post_ra>
// kernel: spatial_attention.1
= control target key start
LH: loop header
LB: loop body
LE: loop exit
PB: predicated region body
PF: predicated region fallthrough
CT: control target
= control target key end

     0   :  { %8 = vsyncpa [#allocation5], 0  ;;  %s3119_s0 = inlined_call_operand.vmem [shape: f32[98], index: 0, kind: input, shape index: {}]   ;;  %s3120_s1 = inlined_call_operand.vmem [shape: s32[1,256], index: 1, kind: input, shape index: {}]   ;;  %s3121_s2 = inlined_call_operand.vmem [shape: f32[2,4,256], index: 2, kind: input, shape index: {}]   ;;  %s3122_s3 = inlined_call_operand.vmem [shape: f32[2,256], index: 3, kind: output, shape index: {}]  }
   0x1   :  { %s15_s14 = sshll.u32 %s3119_s0, 4  ;;  %s16_s14 = int_to_ptr.vmem [resolvable:$true] %s15_s14 }
   0x2   :  { %s1927_s15 = scalar_lea.vmem %s16_s14, 16  ;;  %p1932_p1 = scmp.lt.s32.totalorder %s16_s14, %s16_s14 }
   0x3   :  { %p1928_p0 = scmp.ne.s32.totalorder %s16_s14, %s1927_s15  ;;  %p1933_p2 = scmp.lt.s32.totalorder %s1927_s15, %s1927_s15 }
   0x5   :  { %p1934_p3 = por %p1933_p2, %p1932_p1 }
   0x7   :  { %p1935_p4 = pnand %p1934_p3, %p1928_p0 }
   0x9   :  { %1938 = shalt.err (!%p1935_p4)
}
   0xa   :  { %s1941_s16 = smov [#allocation4]  }
   0xb   :  { %18 = dma.vmem_to_smem %s16_s14, 16, %s1941_s16, [#allocation5]  }
   0xc   :  { %1939 = dma.done.wait [#allocation5], 16  }
   0xd   :  { %1940 = vsyncadd [#allocation5], 4294967280 }
   0xe   :  { %26 = sfence }
   0xf   :  { %v27_v0 = vld [vmem:[%s3121_s2] sm:$0xff]  ;;  %v28_v1 = vld [vmem:[%s3121_s2 + $0x8] sm:$0xff]  ;;  %vm35_vm0 = vcmask 1043456   ;;  %v1942_v6 = vmov 0.0   ;;  %v106_v27 = vlaneseq  ;;  %v1943_v35 = vmov 1983009808  }
  0x10   :  { %v31_v2 = vcombine.high %v27_v0, %v27_v0  ;;  %v32_v3 = vcombine.high %v28_v1, %v28_v1  ;;  %v36_v4 = vsel %vm35_vm0, %v27_v0, 0.0  ;;  %v50_v5 = vsel %vm35_vm0, %v28_v1, 0.0  ;;  %96 = vst [vmem:[#allocation2] sm:$0xff] %v1942_v6  ;;  %97 = vst [vmem:[#allocation3] sm:$0xff] %v1942_v6  ;;  %s1783_s0 = sld [smem:[#allocation4 + $0x38]]  ;;  %s1785_s2 = sld [smem:[#allocation4 + $0x3f]] }
  0x11   :  { %v51_v7 = vrot.slane %v50_v5, 4  ;;  %v64_v8 = vsel %vm35_vm0, %v27_v0, -inf  ;;  %v78_v9 = vsel %vm35_vm0, %v28_v1, -inf  ;;  %v37_v14 = vrot.slane %v36_v4, 4  ;;  %s1944_s21 = smov 114   ;;  %s1945_s22 = smov 115  }
  0x12   :  { %v57_v10 = vsel %vm35_vm0, %v32_v3, 0.0  ;;  %v65_v11 = vrot.slane %v64_v8, 4  ;;  %v71_v12 = vsel %vm35_vm0, %v31_v2, -inf  ;;  %v79_v13 = vrot.slane %v78_v9, 4  ;;  %s1787_s23 = sld [smem:[#allocation4 + $0x46]]  ;;  %s1946_s24 = smov 99  }
  0x13   :  { %v52_v15 = vadd.f32 %v51_v7, %v50_v5  ;;  %v58_v16 = vrot.slane %v57_v10, 4  ;;  %v72_v17 = vrot.slane %v71_v12, 4  ;;  %v85_v20 = vsel %vm35_vm0, %v32_v3, -inf  ;;  %s1947_s25 = smov 112   ;;  %s1797_s26 = sld [smem:[#allocation4 + $0x39]] }
  0x14   :  { %v66_v18 = vmax.f32 %v64_v8, %v65_v11  ;;  %v80_v19 = vmax.f32 %v78_v9, %v79_v13  ;;  %v86_v26 = vrot.slane %v85_v20, 4  ;;  %v38_v28 = vadd.f32 %v37_v14, %v36_v4  ;;  %s1948_s27 = smov 83   ;;  %s1784_s28 = sld [smem:[#allocation4 + $0xe]] }
  0x15   :  { %v53_v21 = vrot.slane %v52_v15, 2  ;;  %v59_v22 = vadd.f32 %v58_v16, %v57_v10  ;;  %v73_v23 = vmax.f32 %v71_v12, %v72_v17  ;;  %v104_v36 = vunpack.c.l.s4 %v1943_v35  ;;  %s1799_s29 = sld [smem:[#allocation4 + $0x40]]  ;;  %s1949_s30 = smov 96  }
  0x16   :  { %v67_v24 = vrot.slane %v66_v18, 2  ;;  %v81_v25 = vrot.slane %v80_v19, 2  ;;  %v87_v34 = vmax.f32 %v85_v20, %v86_v26  ;;  %v39_v42 = vrot.slane %v38_v28, 2  ;;  %s1796_s4 = sld [smem:[#allocation4 + $0x8]]  ;;  %s1801_s5 = sld [smem:[#allocation4 + $0x47]] }
  0x17   :  { %v54_v29 = vadd.f32 %v53_v21, %v52_v15  ;;  %v60_v30 = vrot.slane %v59_v22, 2  ;;  %v74_v31 = vrot.slane %v73_v23, 2  ;;  %v105_v48 = vunpack.c.0.s8 %v104_v36  ;;  %s1950_s6 = smov 80   ;;  %s1798_s7 = sld [smem:[#allocation4 + $0xf]] }
  0x18   :  { %v68_v32 = vmax.f32 %v66_v18, %v67_v24  ;;  %v82_v33 = vmax.f32 %v80_v19, %v81_v25  ;;  %v88_v41 = vrot.slane %v87_v34, 2  ;;  %v2012_v49 = vshrl.u32 %v106_v27, 7  ;;  %s1782_s8 = sld [smem:[#allocation4 + $0x7]]  ;;  %s1800_s9 = sld [smem:[#allocation4 + $0x16]] }
  0x19   :  { %v61_v37 = vadd.f32 %v60_v30, %v59_v22  ;;  %v75_v38 = vmax.f32 %v73_v23, %v74_v31  ;;  %v55_v43 = vrot.slane %v54_v29, 1  ;;  %v43_v53 = vsel %vm35_vm0, %v31_v2, 0.0  ;;  %s1786_s10 = sld [smem:[#allocation4 + $0x15]]  ;;  %s1951_s11 = smov 98  }
  0x1a   :  { %v69_v39 = vrot.slane %v68_v32, 1  ;;  %v83_v40 = vrot.slane %v82_v33, 1  ;;  %v89_v47 = vmax.f32 %v87_v34, %v88_v41  ;;  %v40_v54 = vadd.f32 %v39_v42, %v38_v28  ;;  %s1952_s12 = smov 82   ;;  %s1953_s13 = smov 113  }
  0x1b   :  { %v62_v44 = vrot.slane %v61_v37, 1  ;;  %v76_v45 = vrot.slane %v75_v38, 1  ;;  %v56_v55 = vadd.f32 %v55_v43, %v54_v29  ;;  %v44_v57 = vrot.slane %v43_v53, 4  ;;  %s1954_s14 = smov 97   ;;  %s1955_s15 = smov 127  }
  0x1c   :  { %v70_v46 = vmax.f32 %v68_v32, %v69_v39  ;;  %v84_v51 = vmax.f32 %v82_v33, %v83_v40  ;;  %v90_v52 = vrot.slane %v89_v47, 1  ;;  %v2016_v59 = vsub.s32 %v105_v48, %v2012_v49  ;;  %s1956_s16 = smov 81   ;;  %s1957_s17 = smov 111  }
  0x1d   :  { %v77_v50 = vmax.f32 %v75_v38, %v76_v45  ;;  %v63_v56 = vadd.f32 %v62_v44, %v61_v37  ;;  %v45_v61 = vadd.f32 %v44_v57, %v43_v53  ;;  %v41_v63 = vrot.slane %v40_v54, 1  ;;  %s1958_s18 = smov 126   ;;  %s1959_s19 = smov 95  }
  0x1e   :  { %v91_v58 = vmax.f32 %v89_v47, %v90_v52  ;;  %vm123_vm1 = vcmask 1041409   ;;  %vm125_vm2 = vcmask 1043459   ;;  %vm127_vm3 = vcmask 1045509   ;;  %s1960_s20 = smov 110  }
  0x1f   :  { %v137_v60 = vcombine.low %v70_v46, %v77_v50  ;;  %v110_v0 = vcombine.low %v56_v55, %v63_v56  ;;  %v46_v1 = vrot.slane %v45_v61, 2  ;;  %v42_v6 = vadd.f32 %v41_v63, %v40_v54 }
  0x20   :  { %v145_v62 = vcombine.low %v84_v51, %v91_v58  ;;  %vm129_vm4 = vcmask 1047559   ;;  %v251_v20 = vstv %s1783_s0  ;;  %v272_v24 = vstv %s1785_s2  ;;  %s1961_s0 = smov 125   ;;  %s1962_s2 = smov 79  }
  0x21   :  { %v144_v3 = vrot.slane %v137_v60, %v2016_v59  ;;  %v47_v2 = vadd.f32 %v46_v1, %v45_v61  ;;  %v117_v7 = vrot.slane %v110_v0, %v2016_v59  ;;  %v293_v28 = vstv %s1787_s23  ;;  %s1810_s23 = sld [smem:[#allocation4 + $0x9]] }
  0x22   :  { %v152_v4 = vrot.slane %v145_v62, %v2016_v59  ;;  %v467_v30 = vstv %s1797_s26  ;;  %v269_v32 = vstv %s1784_s28  ;;  %v487_v33 = vstv %s1799_s29  ;;  %s1965_s26 = smov 78   ;;  %s1812_s28 = sld [smem:[#allocation4 + $0x10]] }
  0x23   :  { %v48_v8 = vrot.slane %v47_v2, 1  ;;  %v122_v13 = vrot.slane %v117_v7, 7  ;;  %v464_v36 = vstv %s1796_s4  ;;  %v507_v37 = vstv %s1801_s5  ;;  %s1813_s29 = sld [smem:[#allocation4 + $0x41]]  ;;  %s1966_s4 = smov 93  }
  0x24   :  { %v155_v5 = vrot.slane %v152_v4, 7  ;;  %v484_v40 = vstv %s1798_s7  ;;  %v248_v41 = vstv %s1782_s8  ;;  %v504_v44 = vstv %s1800_s9  ;;  %s1824_s5 = sld [smem:[#allocation4 + $0xa]]  ;;  %s1825_s7 = sld [smem:[#allocation4 + $0x3b]] }
  0x25   :  { %v49_v11 = vadd.f32 %v48_v8, %v47_v2  ;;  %v290_v45 = vstv %s1786_s10  ;;  %s1967_s8 = smov 77   ;;  %s1814_s9 = sld [smem:[#allocation4 + $0x17]]  ;;  %vm529_vm5 = vcmask 932864   ;;  %vm317_vm6 = vcmask 941056  }
  0x26   :  { %v156_v9 = vsel %vm123_vm1, %v155_v5, %v144_v3  ;;  %s1815_s10 = sld [smem:[#allocation4 + $0x48]]  ;;  %vm352_vm7 = vcmask 809984   ;;  %vm385_vm8 = vcmask 678912   ;;  %vm563_vm9 = vcmask 801792  }
  0x27   :  { %v157_v10 = vsel %vm125_vm2, %v155_v5, %v156_v9  ;;  %v102_v15 = vcombine.low %v42_v6, %v49_v11  ;;  %v677_v48 = vstv %s1810_s23  ;;  %s2207_s23 = sld [smem:[#allocation4 + $0x1e]]  ;;  %vm742_vm10 = vcmask 924672  }
  0x28   :  { %v158_v12 = vsel %vm127_vm3, %v155_v5, %v157_v10  ;;  %v697_v55 = vstv %s1812_s28  ;;  %s2213_s28 = sld [smem:[#allocation4 + $0x12]]  ;;  %vm596_vm11 = vcmask 670720   ;;  %vm776_vm12 = vcmask 793600  }
  0x29   :  { %v159_v14 = vsel %vm129_vm4, %v155_v5, %v158_v12  ;;  %v109_v16 = vrot.slane %v102_v15, %v2016_v59  ;;  %v700_v58 = vstv %s1813_s29  ;;  %s2223_s29 = sld [smem:[#allocation4 + $0x2a]]  ;;  %vm1132_vm13 = vcmask 1039360  }
  0x2a   :  { %161 = vst [vmem:[#allocation3 + $0x2] sm:$0xf] %v159_v14  ;;  %v890_v62 = vstv %s1824_s5  ;;  %v893_v0 = vstv %s1825_s7  ;;  %s2230_s5 = sld [smem:[#allocation4 + $0x42]]  ;;  %s2241_s7 = sld [smem:[#allocation4 + $0x18]]  ;;  %vm257_vm14 = vcmask 916480   ;;  %vm809_vm15 = vcmask 662528  }
  0x2b   :  { %v124_v17 = vsel %vm123_vm1, %v122_v13, %v109_v16  ;;  %v717_v2 = vstv %s1814_s9  ;;  %s2243_s9 = sld [smem:[#allocation4 + $0x4f]]  ;;  %vm1165_vm0 = vcmask 908288   ;;  %vm1356_vm1 = vcmask 1031168  }
  0x2c   :  { %v126_v18 = vsel %vm125_vm2, %v122_v13, %v124_v17  ;;  %v720_v6 = vstv %s1815_s10  ;;  %s2253_s10 = sld [smem:[#allocation4 + $0x43]]  ;;  %vm278_vm2 = vcmask 785408  }
  0x2d   :  { %v128_v19 = vsel %vm127_vm3, %v122_v13, %v126_v18  ;;  %vm1198_vm3 = vcmask 777216  }
  0x2e   :  { %v130_v21 = vsel %vm129_vm4, %v122_v13, %v128_v19  ;;  %vm1389_vm4 = vcmask 900096  }
  0x2f   :  { %132 = vst [vmem:[#allocation2 + $0x2] sm:$0xf] %v130_v21 }
  0x31   :  { %v2028_v22 = vld [vmem:[#allocation3] sm:$0xff] }
  0x32   :  { %535 = vrot.lane.b32.xlu0 %v2028_v22, %s1944_s21  ;;  %324 = vrot.lane.b32.xlu1 %v2028_v22, %s1945_s22  ;;  %v252_v23 = vmul.f32 %v251_v20, %v2028_v22  ;;  %v273_v27 = vmul.f32 %v272_v24, %v2028_v22  ;;  %v294_v29 = vmul.f32 %v293_v28, %v2028_v22 }
  0x33   :  { %v468_v31 = vmul.f32 %v467_v30, %v2028_v22  ;;  %v488_v35 = vmul.f32 %v487_v33, %v2028_v22  ;;  %v508_v39 = vmul.f32 %v507_v37, %v2028_v22  ;;  %v701_v61 = vmul.f32 %v700_v58, %v2028_v22 }
  0x34   :  { %v894_v4 = vmul.f32 %v893_v0, %v2028_v22  ;;  %v721_v9 = vmul.f32 %v720_v6, %v2028_v22 }
  0x36   :  { %358 = vrot.lane.b32.xlu1 %v2028_v22, %s1946_s24  ;;  %262 = vrot.lane.b32.xlu0 %v252_v23, %s1947_s25  ;;  %v237_v25 = vld [vmem:[#allocation2] sm:$0xff] }
  0x37   :  { %v2036_v26 = vmul.f32 0.25, %v237_v25 }
  0x39   :  { %v270_v34 = vmul.f32 %v269_v32, %v2036_v26  ;;  %v465_v38 = vmul.f32 %v464_v36, %v2036_v26  ;;  %v485_v42 = vmul.f32 %v484_v40, %v2036_v26  ;;  %v249_v43 = vmul.f32 %v248_v41, %v2036_v26 }
  0x3a   :  { %391 = vrot.lane.b32.xlu1 %v2028_v22, %s1948_s27  ;;  %313 = vrot.lane.b32.xlu0 %v2036_v26, %s1945_s22  ;;  %v505_v46 = vmul.f32 %v504_v44, %v2036_v26  ;;  %v291_v47 = vmul.f32 %v290_v45, %v2036_v26  ;;  %s1964_s22 = smov 109   ;;  %v678_v53 = vmul.f32 %v677_v48, %v2036_v26 }
  0x3b   :  { %v698_v60 = vmul.f32 %v697_v55, %v2036_v26  ;;  %v891_v3 = vmul.f32 %v890_v62, %v2036_v26  ;;  %v718_v8 = vmul.f32 %v717_v2, %v2036_v26 }
  0x3e   :  { %283 = vrot.lane.b32.xlu1 %v273_v27, %s1949_s30  ;;  %348 = vrot.lane.b32.xlu0 %v2036_v26, %s1946_s24  ;;  %s1811_s24 = sld [smem:[#allocation4 + $0x3a]] }
  0x42   :  { %304 = vrot.lane.b32.xlu1 %v294_v29, %s1950_s6  ;;  %381 = vrot.lane.b32.xlu0 %v2036_v26, %s1948_s27 }
  0x44   :  { %v680_v52 = vstv %s1811_s24  ;;  %s2211_s24 = sld [smem:[#allocation4 + $0x23]] }
  0x45   :  { %v681_v54 = vmul.f32 %v680_v52, %v2028_v22 }
  0x46   :  { %525 = vrot.lane.b32.xlu1 %v2036_v26, %s1944_s21  ;;  %477 = vrot.lane.b32.xlu0 %v468_v31, %s1947_s25  ;;  %s1963_s21 = smov 94  }
  0x4a   :  { %275 = vrot.lane.b32.xlu1 %v270_v34, %s1949_s30  ;;  %497 = vrot.lane.b32.xlu0 %v488_v35, %s1949_s30 }
  0x4e   :  { %470 = vrot.lane.b32.xlu1 %v465_v38, %s1947_s25  ;;  %517 = vrot.lane.b32.xlu0 %v508_v39, %s1950_s6 }
  0x52   :  { %490 = vrot.lane.b32.xlu1 %v485_v42, %s1949_s30  ;;  %254 = vrot.lane.b32.xlu0 %v249_v43, %s1947_s25 }
  0x56   :  { %510 = vrot.lane.b32.xlu1 %v505_v46, %s1950_s6  ;;  %296 = vrot.lane.b32.xlu0 %v291_v47, %s1950_s6 }
  0x5a   :  { %559 = vrot.lane.b32.xlu1 %v2036_v26, %s1951_s11  ;;  %569 = vrot.lane.b32.xlu0 %v2028_v22, %s1951_s11  ;;  %s1838_s11 = sld [smem:[#allocation4 + $0xb]] }
  0x5e   :  { %592 = vrot.lane.b32.xlu1 %v2036_v26, %s1952_s12  ;;  %738 = vrot.lane.b32.xlu0 %v2036_v26, %s1953_s13 }
  0x60   :  { %v1087_v10 = vstv %s1838_s11  ;;  %s2258_s11 = sld [smem:[#allocation4 + $0x2b]] }
  0x61   :  { %v1088_v18 = vmul.f32 %v1087_v10, %v2036_v26 }
  0x62   :  { %748 = vrot.lane.b32.xlu1 %v2028_v22, %s1953_s13  ;;  %602 = vrot.lane.b32.xlu0 %v2028_v22, %s1952_s12  ;;  %s1839_s13 = sld [smem:[#allocation4 + $0x3c]] }
  0x66   :  { %772 = vrot.lane.b32.xlu1 %v2036_v26, %s1954_s14  ;;  %782 = vrot.lane.b32.xlu0 %v2028_v22, %s1954_s14  ;;  %s2148_s14 = sld [smem:[#allocation4 + $0x4d]] }
  0x68   :  { %v1090_v12 = vstv %s1839_s13  ;;  %s2266_s13 = sld [smem:[#allocation4 + $0x25]] }
  0x69   :  { %v1091_v19 = vmul.f32 %v1090_v12, %v2028_v22 }
  0x6a   :  { %1128 = vrot.lane.b32.xlu1 %v2036_v26, %s1955_s15  ;;  %1138 = vrot.lane.b32.xlu0 %v2028_v22, %s1955_s15  ;;  %s2152_s15 = sld [smem:[#allocation4 + $0x4e]] }
  0x6c   :  { %v322_v25 = vstv %s2148_s14  ;;  %s2272_s14 = sld [smem:[#allocation4 + $0x3d]] }
  0x6e   :  { %955 = vrot.lane.b32.xlu1 %v2036_v26, %s1947_s25  ;;  %964 = vrot.lane.b32.xlu0 %v2028_v22, %s1947_s25 }
  0x70   :  { %v534_v28 = vstv %s2152_s15  ;;  %s2285_s15 = sld [smem:[#allocation4 + $0x49]] }
  0x72   :  { %805 = vrot.lane.b32.xlu1 %v2036_v26, %s1956_s16  ;;  %815 = vrot.lane.b32.xlu0 %v2028_v22, %s1956_s16 }
  0x76   :  { %1161 = vrot.lane.b32.xlu1 %v2036_v26, %s1957_s17  ;;  %1171 = vrot.lane.b32.xlu0 %v2028_v22, %s1957_s17  ;;  %s2158_s17 = sld [smem:[#allocation4 + $0x54]] }
  0x7a   :  { %1352 = vrot.lane.b32.xlu1 %v2036_v26, %s1958_s18  ;;  %1362 = vrot.lane.b32.xlu0 %v2028_v22, %s1958_s18  ;;  %s1793_s18 = sld [smem:[#allocation4 + $0x5b]] }
  0x7c   :  { %v357_v32 = vstv %s2158_s17  ;;  %s2296_s17 = sld [smem:[#allocation4 + $0x13]] }
  0x7e   :  { %987 = vrot.lane.b32.xlu1 %v2036_v26, %s1949_s30  ;;  %996 = vrot.lane.b32.xlu0 %v2028_v22, %s1949_s30 }
  0x80   :  { %v390_v43 = vstv %s1793_s18  ;;  %s2303_s18 = sld [smem:[#allocation4 + $0x5c]] }
  0x82   :  { %1194 = vrot.lane.b32.xlu1 %v2036_v26, %s1959_s19  ;;  %1204 = vrot.lane.b32.xlu0 %v2028_v22, %s1959_s19  ;;  %s1802_s19 = sld [smem:[#allocation4 + $0x1d]] }
  0x86   :  { %1385 = vrot.lane.b32.xlu1 %v2036_v26, %s1960_s20  ;;  %1395 = vrot.lane.b32.xlu0 %v2028_v22, %s1960_s20  ;;  %s1804_s20 = sld [smem:[#allocation4 + $0x24]] }
  0x88   :  { %v524_v45 = vstv %s1802_s19  ;;  %s2311_s19 = sld [smem:[#allocation4 + $0xd]] }
  0x8a   :  { %1576 = vrot.lane.b32.xlu1 %v2036_v26, %s1961_s0  ;;  %1586 = vrot.lane.b32.xlu0 %v2028_v22, %s1961_s0  ;;  %s1805_s0 = sld [smem:[#allocation4 + $0x55]] }
  0x8c   :  { %v558_v55 = vstv %s1804_s20  ;;  %s2318_s20 = sld [smem:[#allocation4 + $0x56]] }
  0x8e   :  { %1019 = vrot.lane.b32.xlu1 %v2036_v26, %s1950_s6  ;;  %1028 = vrot.lane.b32.xlu0 %v2028_v22, %s1950_s6 }
  0x92   :  { %1227 = vrot.lane.b32.xlu1 %v2036_v26, %s1962_s2  ;;  %1236 = vrot.lane.b32.xlu0 %v2028_v22, %s1962_s2 }
  0x96   :  { %1418 = vrot.lane.b32.xlu1 %v2036_v26, %s1963_s21  ;;  %1428 = vrot.lane.b32.xlu0 %v2028_v22, %s1963_s21  ;;  %s1826_s21 = sld [smem:[#allocation4 + $0x11]] }
  0x9a   :  { %1609 = vrot.lane.b32.xlu1 %v2036_v26, %s1964_s22  ;;  %1619 = vrot.lane.b32.xlu0 %v2028_v22, %s1964_s22  ;;  %s2202_s22 = sld [smem:[#allocation4 + $0x1c]] }
  0x9e   :  { %1451 = vrot.lane.b32.xlu1 %v2036_v26, %s1965_s26  ;;  %1460 = vrot.lane.b32.xlu0 %v2028_v22, %s1965_s26 }
  0xa0   :  { %v311_v10 = vstv %s2202_s22  ;;  %s2343_s22 = sld [smem:[#allocation4 + $0x2c]] }
  0xa2   :  { %1642 = vrot.lane.b32.xlu1 %v2036_v26, %s1966_s4  ;;  %1652 = vrot.lane.b32.xlu0 %v2028_v22, %s1966_s4  ;;  %s2227_s4 = sld [smem:[#allocation4 + $0xc]] }
  0xa4   :  { %v2120_v50 = vpop.permute.xlu0 %535  ;;  %v325_v51 = vpop.permute.xlu1 %324 }
  0xa5   :  { %v326_v13 = vrot.slane %v325_v51, 2  ;;  %v327_v14 = vrot.slane %v325_v51, 4  ;;  %v537_v16 = vrot.slane %v2120_v50, 2  ;;  %v538_v17 = vrot.slane %v2120_v50, 4 }
  0xa6   :  { %1675 = vrot.lane.b32.xlu1 %v2036_v26, %s1967_s8  ;;  %1684 = vrot.lane.b32.xlu0 %v2028_v22, %s1967_s8 }
  0xa7   :  { %v328_v27 = vsel %vm317_vm6, %v326_v13, %v327_v14  ;;  %v539_v29 = vsel %vm529_vm5, %v537_v16, %v538_v17 }
  0xa8   :  { %v2128_v56 = vpop.permute.xlu1 %358  ;;  %v2130_v57 = vpop.permute.xlu0 %262  ;;  %v330_v31 = vmul.f32 %v328_v27, %v322_v25  ;;  %v541_v36 = vmul.f32 %v539_v29, %v534_v28  ;;  %v347_v27 = vstv %s2211_s24  ;;  %s2361_s24 = sld [smem:[#allocation4 + $0x3e]] }
  0xa9   :  { %v360_v21 = vrot.slane %v2128_v56, 2  ;;  %v361_v23 = vrot.slane %v2128_v56, 4 }
  0xaa   :  { %683 = vrot.lane.b32.xlu1 %v678_v53, %s1947_s25  ;;  %690 = vrot.lane.b32.xlu0 %v681_v54, %s1947_s25 }
  0xab   :  { %v362_v37 = vsel %vm352_vm7, %v360_v21, %v361_v23 }
  0xac   :  { %v2136_v63 = vpop.permute.xlu1 %391  ;;  %v2138_v1 = vpop.permute.xlu0 %313  ;;  %v364_v41 = vmul.f32 %v362_v37, %v357_v32 }
  0xad   :  { %v393_v33 = vrot.slane %v2136_v63, 2  ;;  %v394_v34 = vrot.slane %v2136_v63, 4  ;;  %v315_v56 = vrot.slane %v2138_v1, 2  ;;  %v316_v58 = vrot.slane %v2138_v1, 4 }
  0xae   :  { %703 = vrot.lane.b32.xlu1 %v698_v60, %s1949_s30  ;;  %710 = vrot.lane.b32.xlu0 %v701_v61, %s1949_s30 }
  0xaf   :  { %v395_v44 = vsel %vm385_vm8, %v393_v33, %v394_v34  ;;  %v318_v14 = vsel %vm317_vm6, %v315_v56, %v316_v58  ;;  %v1107_v33 = vstv %s2213_s28  ;;  %v930_v58 = vstv %s2241_s7  ;;  %s2368_s28 = sld [smem:[#allocation4 + $0x20]]  ;;  %s2410_s7 = sld [smem:[#allocation4 + $0x26]] }
  0xb0   :  { %v2144_v5 = vpop.permute.xlu1 %283  ;;  %v2146_v7 = vpop.permute.xlu0 %348  ;;  %v397_v48 = vmul.f32 %v395_v44, %v390_v43  ;;  %vm299_vm6 = vcmask 654336  }
  0xb1   :  { %v350_v16 = vrot.slane %v2146_v7, 2  ;;  %v351_v17 = vrot.slane %v2146_v7, 4  ;;  %v320_v7 = vmul.f32 %v318_v14, %v311_v10  ;;  %v1110_v10 = vstv %s2253_s10  ;;  %s2427_s10 = sld [smem:[#allocation4 + $0x27]] }
  0xb2   :  { %896 = vrot.lane.b32.xlu1 %v891_v3, %s1947_s25  ;;  %903 = vrot.lane.b32.xlu0 %v894_v4, %s1947_s25  ;;  %v568_v3 = vstv %s1805_s0  ;;  %v910_v4 = vstv %s1826_s21  ;;  %v1111_v14 = vmul.f32 %v1110_v10, %v2028_v22  ;;  %s2327_s0 = sld [smem:[#allocation4 + $0x1f]]  ;;  %s2337_s21 = sld [smem:[#allocation4 + $0x4a]] }
  0xb3   :  { %v911_v13 = vmul.f32 %v910_v4, %v2036_v26 }
  0xb4   :  { %v2156_v11 = vpop.permute.xlu1 %304  ;;  %v2160_v15 = vpop.permute.xlu0 %381 }
  0xb5   :  { %v383_v28 = vrot.slane %v2160_v15, 2  ;;  %v384_v29 = vrot.slane %v2160_v15, 4  ;;  %v380_v15 = vstv %s2223_s29  ;;  %s2386_s29 = sld [smem:[#allocation4 + $0x50]] }
  0xb6   :  { %723 = vrot.lane.b32.xlu1 %v718_v8, %s1950_s6  ;;  %730 = vrot.lane.b32.xlu0 %v721_v9, %s1950_s6 }
  0xb8   :  { %v526_v20 = vpop.permute.xlu1 %525  ;;  %v2170_v24 = vpop.permute.xlu0 %477 }
  0xb9   :  { %v527_v38 = vrot.slane %v526_v20, 2  ;;  %v528_v39 = vrot.slane %v526_v20, 4  ;;  %v737_v20 = vstv %s2207_s23  ;;  %s2345_s23 = sld [smem:[#allocation4 + $0x44]] }
  0xba   :  { %1093 = vrot.lane.b32.xlu1 %v1088_v18, %s1947_s25  ;;  %1100 = vrot.lane.b32.xlu0 %v1091_v19, %s1947_s25 }
  0xbb   :  { %v530_v46 = vsel %vm529_vm5, %v527_v38, %v528_v39  ;;  %v386_v38 = vsel %vm385_vm8, %v383_v28, %v384_v29  ;;  %v1108_v39 = vmul.f32 %v1107_v33, %v2036_v26  ;;  %v936_v29 = vrot.slane %v2028_v22, 2 }
  0xbc   :  { %v2178_v30 = vpop.permute.xlu1 %275  ;;  %v2183_v35 = vpop.permute.xlu0 %497  ;;  %v532_v51 = vmul.f32 %v530_v46, %v524_v45  ;;  %v913_v46 = vstv %s2230_s5  ;;  %s2401_s5 = sld [smem:[#allocation4 + $0x5d]]  ;;  %vm1580_vm5 = vcmask 1022976  }
  0xbd   :  { %v914_v56 = vmul.f32 %v913_v46, %v2028_v22  ;;  %v601_v46 = vstv %s2303_s18  ;;  %s2482_s18 = sld [smem:[#allocation4 + $0x2d]] }
  0xbe   :  { %340 = vrot.lane.b32.xlu1 %v330_v31, %s1967_s8  ;;  %551 = vrot.lane.b32.xlu0 %v541_v36, %s1965_s26  ;;  %v353_v31 = vsel %vm352_vm7, %v350_v16, %v351_v17  ;;  %vm759_vm7 = vcmask 646144  }
  0xbf   :  { %v355_v37 = vmul.f32 %v353_v31, %v347_v27 }
  0xc0   :  { %v2188_v40 = vpop.permute.xlu1 %470  ;;  %v2190_v42 = vpop.permute.xlu0 %517 }
  0xc2   :  { %373 = vrot.lane.b32.xlu1 %v364_v41, %s1967_s8  ;;  %v1311_v41 = vstv %s2227_s4  ;;  %s2390_s4 = sld [smem:[#allocation4 + $0x14]] }
  0xc4   :  { %v2195_v47 = vpop.permute.xlu1 %490  ;;  %v2197_v50 = vpop.permute.xlu0 %254 }
  0xc6   :  { %406 = vrot.lane.b32.xlu1 %v397_v48, %s1967_s8 }
  0xc8   :  { %v2200_v52 = vpop.permute.xlu1 %510  ;;  %v2204_v53 = vpop.permute.xlu0 %296 }
  0xca   :  { %543 = vrot.lane.b32.xlu1 %v532_v51, %s1965_s26  ;;  %v388_v51 = vmul.f32 %v386_v38, %v380_v15 }
  0xcc   :  { %v560_v54 = vpop.permute.xlu1 %559  ;;  %v570_v62 = vpop.permute.xlu0 %569 }
  0xcd   :  { %v561_v60 = vrot.slane %v560_v54, 2  ;;  %v562_v61 = vrot.slane %v560_v54, 4  ;;  %v571_v63 = vrot.slane %v570_v62, 2  ;;  %v572_v0 = vrot.slane %v570_v62, 4 }
  0xce   :  { %v1312_v54 = vmul.f32 %v1311_v41, %v2036_v26 }
  0xcf   :  { %v564_v2 = vsel %vm563_vm9, %v561_v60, %v562_v61  ;;  %v573_v9 = vsel %vm563_vm9, %v571_v63, %v572_v0  ;;  %v747_v61 = vstv %s2243_s9  ;;  %s2421_s9 = sld [smem:[#allocation4 + $0x51]]  ;;  %vm1422_vm9 = vcmask 769024  }
  0xd0   :  { %v2215_v6 = vpop.permute.xlu1 %592  ;;  %v566_v8 = vmul.f32 %v564_v2, %v558_v55  ;;  %v739_v12 = vpop.permute.xlu0 %738  ;;  %v575_v1 = vmul.f32 %v573_v9, %v568_v3  ;;  %v931_v55 = vrot.slane %v2036_v26, 2 }
  0xd1   :  { %v740_v18 = vrot.slane %v739_v12, 2  ;;  %v741_v19 = vrot.slane %v739_v12, 4  ;;  %v594_v63 = vrot.slane %v2215_v6, 2  ;;  %v595_v0 = vrot.slane %v2215_v6, 4 }
  0xd2   :  { %577 = vrot.lane.b32.xlu1 %v566_v8, %s1965_s26  ;;  %584 = vrot.lane.b32.xlu0 %v575_v1, %s1965_s26  ;;  %v933_v4 = vmul.f32 %v931_v55, %v930_v58  ;;  %v591_v1 = vstv %s2258_s11  ;;  %s2445_s11 = sld [smem:[#allocation4 + $0x21]] }
  0xd3   :  { %v743_v23 = vsel %vm742_vm10, %v740_v18, %v741_v19  ;;  %v771_v18 = vstv %s2266_s13  ;;  %s2447_s13 = sld [smem:[#allocation4 + $0x45]] }
  0xd4   :  { %v749_v21 = vpop.permute.xlu1 %748  ;;  %v2232_v25 = vpop.permute.xlu0 %602  ;;  %v745_v32 = vmul.f32 %v743_v23, %v737_v20  ;;  %v1314_v23 = vstv %s2272_s14  ;;  %s2463_s14 = sld [smem:[#allocation4 + $0x1b]] }
  0xd5   :  { %v750_v43 = vrot.slane %v749_v21, 2  ;;  %v751_v44 = vrot.slane %v749_v21, 4  ;;  %v1315_v28 = vmul.f32 %v1314_v23, %v2028_v22  ;;  %v604_v15 = vrot.slane %v2232_v25, 2 }
  0xd6   :  { %916 = vrot.lane.b32.xlu1 %v911_v13, %s1949_s30  ;;  %332 = vrot.lane.b32.xlu0 %v320_v7, %s1967_s8  ;;  %v597_v13 = vsel %vm596_vm11, %v594_v63, %v595_v0  ;;  %v605_v38 = vrot.slane %v2232_v25, 4  ;;  %v781_v0 = vstv %s2318_s20  ;;  %v804_v23 = vstv %s2343_s22  ;;  %s2498_s20 = sld [smem:[#allocation4 + $0x52]] }
  0xd7   :  { %v752_v62 = vsel %vm742_vm10, %v750_v43, %v751_v44  ;;  %v599_v21 = vmul.f32 %v597_v13, %v591_v1  ;;  %v1331_v43 = vstv %s2296_s17  ;;  %s2479_s17 = sld [smem:[#allocation4 + $0x58]]  ;;  %s2546_s22 = sld [smem:[#allocation4 + $0x22]]  ;;  %vm1613_vm10 = vcmask 891904  }
  0xd8   :  { %v773_v34 = vpop.permute.xlu1 %772  ;;  %v2245_v36 = vpop.permute.xlu0 %782  ;;  %v754_v9 = vmul.f32 %v752_v62, %v747_v61  ;;  %v606_v55 = vsel %vm596_vm11, %v604_v15, %v605_v38  ;;  %v1538_v38 = vstv %s2361_s24  ;;  %s2569_s24 = sld [smem:[#allocation4 + $0x5f]] }
  0xd9   :  { %v774_v2 = vrot.slane %v773_v34, 2  ;;  %v775_v8 = vrot.slane %v773_v34, 4  ;;  %v935_v34 = vstv %s2285_s15  ;;  %v785_v25 = vrot.slane %v2245_v36, 4  ;;  %s2477_s15 = sld [smem:[#allocation4 + $0x33]] }
  0xda   :  { %756 = vrot.lane.b32.xlu1 %v745_v32, %s1962_s2  ;;  %366 = vrot.lane.b32.xlu0 %v355_v37, %s1967_s8  ;;  %v938_v41 = vmul.f32 %v936_v29, %v935_v34  ;;  %v608_v63 = vmul.f32 %v606_v55, %v601_v46  ;;  %v1539_v55 = vmul.f32 %v1538_v38, %v2028_v22 }
  0xdb   :  { %v777_v19 = vsel %vm776_vm12, %v774_v2, %v775_v8 }
  0xdc   :  { %v1129_v45 = vpop.permute.xlu1 %1128  ;;  %v2256_v48 = vpop.permute.xlu0 %1138  ;;  %v779_v27 = vmul.f32 %v777_v19, %v771_v18 }
  0xdd   :  { %v1130_v16 = vrot.slane %v1129_v45, 2  ;;  %v1131_v17 = vrot.slane %v1129_v45, 4  ;;  %v1141_v2 = vrot.slane %v2256_v48, 4 }
  0xde   :  { %1113 = vrot.lane.b32.xlu1 %v1108_v39, %s1949_s30  ;;  %399 = vrot.lane.b32.xlu0 %v388_v51, %s1967_s8  ;;  %s2281_s8 = sld [smem:[#allocation4 + $0x19]]  ;;  %v784_v51 = vrot.slane %v2245_v36, 2 }
  0xdf   :  { %v1133_v32 = vsel %vm1132_vm13, %v1130_v16, %v1131_v17  ;;  %v1137_v17 = vstv %s2337_s21  ;;  %s2520_s21 = sld [smem:[#allocation4 + $0x4c]] }
  0xe0   :  { %v2268_v60 = vpop.permute.xlu1 %955  ;;  %v2276_v3 = vpop.permute.xlu0 %964 }
  0xe1   :  { %v957_v36 = vrot.slane %v2268_v60, 2  ;;  %v958_v61 = vrot.slane %v2268_v60, 4  ;;  %v954_v60 = vstv %s2327_s0  ;;  %s2518_s0 = sld [smem:[#allocation4 + $0x28]] }
  0xe2   :  { %1317 = vrot.lane.b32.xlu1 %v1312_v54, %s1947_s25  ;;  %923 = vrot.lane.b32.xlu0 %v914_v56, %s1949_s30  ;;  %v1332_v54 = vmul.f32 %v1331_v43, %v2036_v26  ;;  %v1535_v56 = vstv %s2311_s19  ;;  %s2496_s19 = sld [smem:[#allocation4 + $0x2e]] }
  0xe3   :  { %v1536_v8 = vmul.f32 %v1535_v56, %v2036_v26  ;;  %v959_v1 = vsel %vm257_vm14, %v957_v36, %v958_v61 }
  0xe4   :  { %v2283_v12 = vpop.permute.xlu1 %805  ;;  %v2287_v6 = vpop.permute.xlu0 %815  ;;  %v1127_v31 = vstv %s2281_s8  ;;  %s2470_s8 = sld [smem:[#allocation4 + $0x2]] }
  0xe5   :  { %v1135_v39 = vmul.f32 %v1133_v32, %v1127_v31  ;;  %v808_v13 = vrot.slane %v2283_v12, 4 }
  0xe6   :  { %940 = vrot.lane.b32.xlu1 %v933_v4, %s1950_s6  ;;  %764 = vrot.lane.b32.xlu0 %v754_v9, %s1962_s2  ;;  %v1140_v4 = vrot.slane %v2256_v48, 2  ;;  %v786_v9 = vsel %vm776_vm12, %v784_v51, %v785_v25  ;;  %v807_v48 = vrot.slane %v2283_v12, 2  ;;  %v1160_v51 = vstv %s2368_s28  ;;  %s2574_s28 = sld [smem:[#allocation4 + $0x29]] }
  0xe7   :  { %v788_v16 = vmul.f32 %v786_v9, %v781_v0  ;;  %v966_v25 = vrot.slane %v2276_v3, 2  ;;  %v817_v0 = vrot.slane %v2287_v6, 2  ;;  %vm546_vm12 = vcmask 637952  }
  0xe8   :  { %v2298_v20 = vpop.permute.xlu1 %1161  ;;  %v2301_v7 = vpop.permute.xlu0 %1171  ;;  %v1142_v18 = vsel %vm1132_vm13, %v1140_v4, %v1141_v2  ;;  %v810_v12 = vsel %vm809_vm15, %v807_v48, %v808_v13  ;;  %v818_v4 = vrot.slane %v2287_v6, 4  ;;  %v963_v2 = vstv %s2386_s29  ;;  %s2596_s29 = sld [smem:[#allocation4 + $0x30]] }
  0xe9   :  { %v1164_v29 = vrot.slane %v2298_v20, 4  ;;  %v1144_v32 = vmul.f32 %v1142_v18, %v1137_v17  ;;  %v1173_v18 = vrot.slane %v2301_v7, 2  ;;  %vm1646_vm13 = vcmask 760832  }
  0xea   :  { %610 = vrot.lane.b32.xlu1 %v599_v21, %s1965_s26  ;;  %1120 = vrot.lane.b32.xlu0 %v1111_v14, %s1949_s30  ;;  %v961_v21 = vmul.f32 %v959_v1, %v954_v60  ;;  %v819_v17 = vsel %vm809_vm15, %v817_v0, %v818_v4  ;;  %v1558_v0 = vstv %s2447_s13  ;;  %s2714_s13 = sld [smem:[#allocation4 + $0x32]] }
  0xec   :  { %v2313_v33 = vpop.permute.xlu1 %1352  ;;  %v2316_v37 = vpop.permute.xlu0 %1362 }
  0xed   :  { %v1355_v43 = vrot.slane %v2313_v33, 4  ;;  %v1365_v38 = vrot.slane %v2316_v37, 4 }
  0xee   :  { %790 = vrot.lane.b32.xlu1 %v779_v27, %s1962_s2  ;;  %1324 = vrot.lane.b32.xlu0 %v1315_v28, %s1947_s25  ;;  %v1334_v27 = vstv %s2345_s23  ;;  %v1163_v28 = vrot.slane %v2298_v20, 2  ;;  %v812_v20 = vmul.f32 %v810_v12, %v804_v23  ;;  %s2555_s23 = sld [smem:[#allocation4 + $0x2f]] }
  0xef   :  { %v1335_v34 = vmul.f32 %v1334_v27, %v2028_v22  ;;  %v986_v27 = vstv %s2410_s7  ;;  %s2633_s7 = sld [smem:[#allocation4 + $0x61]] }
  0xf0   :  { %v2325_v44 = vpop.permute.xlu1 %987  ;;  %v2329_v45 = vpop.permute.xlu0 %996 }
  0xf1   :  { %v989_v1 = vrot.slane %v2325_v44, 2  ;;  %v990_v48 = vrot.slane %v2325_v44, 4 }
  0xf2   :  { %1146 = vrot.lane.b32.xlu1 %v1135_v39, %s1956_s16  ;;  %947 = vrot.lane.b32.xlu0 %v938_v41, %s1950_s6  ;;  %v1166_v39 = vsel %vm1165_vm0, %v1163_v28, %v1164_v29  ;;  %v1354_v41 = vrot.slane %v2313_v33, 2 }
  0xf3   :  { %v1168_v33 = vmul.f32 %v1166_v39, %v1160_v51  ;;  %v1170_v39 = vstv %s2421_s9  ;;  %v1193_v51 = vstv %s2427_s10  ;;  %s1822_s9 = sld [smem:[#allocation4 + $0x3]]  ;;  %s1781_s10 = sld [smem:[#allocation4 + $0x31]] }
  0xf4   :  { %v2341_v58 = vpop.permute.xlu1 %1194  ;;  %v2349_v62 = vpop.permute.xlu0 %1204  ;;  %v1357_v36 = vsel %vm1356_vm1, %v1354_v41, %v1355_v43 }
  0xf5   :  { %v1196_v12 = vrot.slane %v2341_v58, 2  ;;  %v1197_v28 = vrot.slane %v2341_v58, 4 }
  0xf6   :  { %1337 = vrot.lane.b32.xlu1 %v1332_v54, %s1949_s30  ;;  %617 = vrot.lane.b32.xlu0 %v608_v63, %s1965_s26  ;;  %s2383_s26 = sld [smem:[#allocation4 + $0x1a]]  ;;  %v967_v54 = vrot.slane %v2276_v3, 4 }
  0xf7   :  { %v1199_v58 = vsel %vm1198_vm3, %v1196_v12, %v1197_v28  ;;  %v671_v12 = vstv %s2470_s8  ;;  %s1969_s8 = smov 50  }
  0xf8   :  { %v2358_v10 = vpop.permute.xlu1 %1385  ;;  %v2366_v14 = vpop.permute.xlu0 %1395  ;;  %v968_v3 = vsel %vm257_vm14, %v966_v25, %v967_v54 }
  0xf9   :  { %v970_v6 = vmul.f32 %v968_v3, %v963_v2  ;;  %v1387_v25 = vrot.slane %v2358_v10, 2  ;;  %v1388_v54 = vrot.slane %v2358_v10, 4  ;;  %v1384_v3 = vstv %s2445_s11  ;;  %s2705_s11 = sld [smem:[#allocation4 + $0x35]] }
  0xfa   :  { %1541 = vrot.lane.b32.xlu1 %v1536_v8, %s1947_s25  ;;  %797 = vrot.lane.b32.xlu0 %v788_v16, %s1962_s2  ;;  %v1555_v8 = vstv %s2390_s4  ;;  %v814_v16 = vstv %s2401_s5  ;;  %s2605_s4 = sld [smem:[#allocation4 + $0x53]]  ;;  %s1875_s5 = sld [smem:[#allocation4 + $0x5a]] }
  0xfb   :  { %v1556_v23 = vmul.f32 %v1555_v8, %v2036_v26  ;;  %v1390_v4 = vsel %vm1389_vm4, %v1387_v25, %v1388_v54 }
  0xfc   :  { %v2374_v19 = vpop.permute.xlu1 %1576  ;;  %v2381_v31 = vpop.permute.xlu0 %1586  ;;  %v1351_v63 = vstv %s2383_s26  ;;  %s2583_s26 = sld [smem:[#allocation4 + $0x59]] }
  0xfd   :  { %v1359_v60 = vmul.f32 %v1357_v36, %v1351_v63  ;;  %v1201_v63 = vmul.f32 %v1199_v58, %v1193_v51  ;;  %v1578_v2 = vrot.slane %v2374_v19, 2  ;;  %v1579_v8 = vrot.slane %v2374_v19, 4 }
  0xfe   :  { %972 = vrot.lane.b32.xlu1 %v961_v21, %s1950_s6  ;;  %1153 = vrot.lane.b32.xlu0 %v1144_v32, %s1956_s16  ;;  %v1174_v21 = vrot.slane %v2301_v7, 4  ;;  %v991_v7 = vsel %vm278_vm2, %v989_v1, %v990_v48  ;;  %v821_v32 = vmul.f32 %v819_v17, %v814_v16  ;;  %v998_v48 = vrot.slane %v2329_v45, 2 }
  0xff   :  { %v993_v43 = vmul.f32 %v991_v7, %v986_v27  ;;  %v1206_v16 = vrot.slane %v2349_v62, 2  ;;  %v1207_v19 = vrot.slane %v2349_v62, 4  ;;  %v1559_v17 = vmul.f32 %v1558_v0, %v2028_v22 }
 0x100   :  { %v2392_v15 = vpop.permute.xlu1 %1019  ;;  %v2398_v46 = vpop.permute.xlu0 %1028  ;;  %v674_v22 = vstv %s2477_s15  ;;  %v672_v58 = vmul.f32 %v671_v12, %v2036_v26  ;;  %s1850_s15 = sld [smem:[#allocation4 + $0x5]] }
 0x101   :  { %v1021_v27 = vrot.slane %v2392_v15, 2  ;;  %v1022_v7 = vrot.slane %v2392_v15, 4  ;;  %v1398_v15 = vrot.slane %v2366_v14, 4 }
 0x102   :  { %823 = vrot.lane.b32.xlu1 %v812_v20, %s1962_s2  ;;  %1344 = vrot.lane.b32.xlu0 %v1335_v34, %s1949_s30  ;;  %v1175_v34 = vsel %vm1165_vm0, %v1173_v18, %v1174_v21  ;;  %v1364_v20 = vrot.slane %v2316_v37, 2  ;;  %v1392_v18 = vmul.f32 %v1390_v4, %v1384_v3  ;;  %v1575_v21 = vstv %s2463_s14  ;;  %s1968_s14 = smov 51  }
 0x103   :  { %vm335_vm0 = vcmask 629760  }
 0x104   :  { %v2408_v56 = vpop.permute.xlu1 %1227  ;;  %v2413_v61 = vpop.permute.xlu0 %1236 }
 0x105   :  { %v1230_v51 = vrot.slane %v2408_v56, 4 }
 0x106   :  { %1179 = vrot.lane.b32.xlu1 %v1168_v33, %s1956_s16  ;;  %1548 = vrot.lane.b32.xlu0 %v1539_v55, %s1947_s25  ;;  %s2439_s25 = sld [smem:[#allocation4 + $0x4b]]  ;;  %v1177_v55 = vmul.f32 %v1175_v34, %v1170_v39  ;;  %v1366_v33 = vsel %vm1356_vm1, %v1364_v20, %v1365_v38  ;;  %v1203_v34 = vstv %s2479_s17  ;;  %v1208_v20 = vsel %vm1198_vm3, %v1206_v16, %v1207_v19  ;;  %s1851_s17 = sld [smem:[#allocation4 + $0x36]] }
 0x107   :  { %v1397_v38 = vrot.slane %v2366_v14, 2  ;;  %v1018_v39 = vstv %s2482_s18  ;;  %v1210_v4 = vmul.f32 %v1208_v20, %v1203_v34  ;;  %v1030_v20 = vrot.slane %v2398_v46, 2  ;;  %s1864_s18 = sld [smem:[#allocation4 + $0x6]] }
 0x108   :  { %v2425_v9 = vpop.permute.xlu1 %1418  ;;  %v2431_v13 = vpop.permute.xlu0 %1428 }
 0x10a   :  { %1370 = vrot.lane.b32.xlu1 %v1359_v60, %s1952_s12  ;;  %979 = vrot.lane.b32.xlu0 %v970_v6, %s1950_s6  ;;  %v999_v6 = vrot.slane %v2329_v45, 4 }
 0x10c   :  { %v2442_v44 = vpop.permute.xlu1 %1609  ;;  %v2452_v29 = vpop.permute.xlu0 %1619  ;;  %v1361_v36 = vstv %s2439_s25  ;;  %v1000_v28 = vsel %vm278_vm2, %v998_v48, %v999_v6  ;;  %v1589_v48 = vrot.slane %v2381_v31, 4  ;;  %s2652_s25 = sld [smem:[#allocation4 + $0x4]] }
 0x10d   :  { %v1368_v1 = vmul.f32 %v1366_v33, %v1361_v36  ;;  %v2531_v36 = vld [vmem:[#allocation3] sm:$0xff] }
 0x10e   :  { %1561 = vrot.lane.b32.xlu1 %v1556_v23, %s1949_s30  ;;  %830 = vrot.lane.b32.xlu0 %v821_v32, %s1962_s2  ;;  %s2472_s2 = sld [smem:[#allocation4 + $0x57]]  ;;  %v1581_v23 = vsel %vm1580_vm5, %v1578_v2, %v1579_v8  ;;  %v675_v14 = vmul.f32 %v2531_v36, %v674_v22  ;;  %v1226_v2 = vstv %s2496_s19  ;;  %v1394_v8 = vstv %s2498_s20  ;;  %s1971_s20 = smov 48  }
 0x10f   :  { %v1583_v54 = vmul.f32 %v1581_v23, %v1575_v21  ;;  %v1420_v23 = vrot.slane %v2425_v9, 2  ;;  %v1417_v22 = vstv %s2518_s0  ;;  %s1865_s19 = sld [smem:[#allocation4 + $0x37]]  ;;  %s1972_s0 = smov 47  }
 0x110   :  { %v2460_v41 = vpop.permute.xlu1 %1451  ;;  %v2468_v37 = vpop.permute.xlu0 %1460 }
 0x112   :  { %1004 = vrot.lane.b32.xlu1 %v993_v43, %s1950_s6  ;;  %1186 = vrot.lane.b32.xlu0 %v1177_v55, %s1956_s16  ;;  %v1229_v43 = vrot.slane %v2408_v56, 2  ;;  %v1023_v55 = vsel %vm299_vm6, %v1021_v27, %v1022_v7  ;;  %v1399_v56 = vsel %vm1389_vm4, %v1397_v38, %v1398_v15  ;;  %v1031_v15 = vrot.slane %v2398_v46, 4 }
 0x113   :  { %v1025_v21 = vmul.f32 %v1023_v55, %v1018_v39  ;;  %v1612_v55 = vrot.slane %v2442_v44, 4 }
 0x114   :  { %v2484_v10 = vpop.permute.xlu1 %1642  ;;  %v2491_v60 = vpop.permute.xlu0 %1652  ;;  %v995_v32 = vstv %s2472_s2  ;;  %v1231_v16 = vsel %vm759_vm7, %v1229_v43, %v1230_v51  ;;  %s1970_s2 = smov 49  }
 0x115   :  { %v1002_v3 = vmul.f32 %v1000_v28, %v995_v32  ;;  %v1585_v32 = vstv %s2520_s21  ;;  %s1973_s21 = smov 46  }
 0x116   :  { %1212 = vrot.lane.b32.xlu1 %v1201_v63, %s1956_s16  ;;  %1377 = vrot.lane.b32.xlu0 %v1368_v1, %s1952_s12  ;;  %v1588_v1 = vrot.slane %v2381_v31, 2  ;;  %v1421_v31 = vrot.slane %v2425_v9, 4  ;;  %v1401_v9 = vmul.f32 %v1399_v56, %v1394_v8  ;;  %v1453_v8 = vrot.slane %v2460_v41, 2 }
 0x117   :  { %v1454_v56 = vrot.slane %v2460_v41, 4 }
 0x118   :  { %v2504_v45 = vpop.permute.xlu1 %1675  ;;  %v2510_v62 = vpop.permute.xlu0 %1684  ;;  %v1590_v34 = vsel %vm1580_vm5, %v1588_v1, %v1589_v48 }
 0x11a   :  { %1403 = vrot.lane.b32.xlu1 %v1392_v18, %s1952_s12  ;;  %1568 = vrot.lane.b32.xlu0 %v1559_v17, %s1949_s30  ;;  %s2542_s30 = sld [smem:[#allocation4 + $0x5e]] }
 0x11c   :  { %v684_v25 = vpop.permute.xlu1 %683  ;;  %v691_v63 = vpop.permute.xlu0 %690 }
 0x11d   :  { %v685_v33 = vrot.slane %v684_v25, 2  ;;  %v692_v0 = vrot.slane %v691_v63, 2 }
 0x11e   :  { %1594 = vrot.lane.b32.xlu1 %v1583_v54, %s1948_s27  ;;  %1011 = vrot.lane.b32.xlu0 %v1002_v3, %s1950_s6  ;;  %v1611_v54 = vrot.slane %v2442_v44, 2  ;;  %v1608_v44 = vstv %s2546_s22 }
 0x11f   :  { %v686_v6 = vsel %vm257_vm14, %v684_v25, %v685_v33  ;;  %v693_v17 = vsel %vm257_vm14, %v691_v63, %v692_v0  ;;  %v1423_v25 = vsel %vm1422_vm9, %v1420_v23, %v1421_v31  ;;  %v1032_v63 = vsel %vm299_vm6, %v1030_v20, %v1031_v15 }
 0x120   :  { %v688_v19 = vadd.f32 %v686_v6, %v672_v58  ;;  %v704_v18 = vpop.permute.xlu1 %703  ;;  %v695_v27 = vadd.f32 %v693_v17, %v675_v14  ;;  %v711_v12 = vpop.permute.xlu0 %710  ;;  %v1233_v58 = vmul.f32 %v1231_v16, %v1226_v2  ;;  %v1027_v46 = vstv %s2542_s30  ;;  %s1974_s30 = smov 45  }
 0x121   :  { %v705_v7 = vrot.slane %v704_v18, 2  ;;  %v712_v28 = vrot.slane %v711_v12, 2  ;;  %v1425_v0 = vmul.f32 %v1423_v25, %v1417_v22  ;;  %v1614_v2 = vsel %vm1613_vm10, %v1611_v54, %v1612_v55 }
 0x122   :  { %1036 = vrot.lane.b32.xlu1 %v1025_v21, %s1950_s6  ;;  %1219 = vrot.lane.b32.xlu0 %v1210_v4, %s1956_s16  ;;  %v1592_v4 = vmul.f32 %v1590_v34, %v1585_v32  ;;  %v1238_v6 = vrot.slane %v2413_v61, 2  ;;  %v1239_v16 = vrot.slane %v2413_v61, 4  ;;  %v1450_v17 = vstv %s2555_s23 }
 0x123   :  { %v706_v38 = vsel %vm278_vm2, %v704_v18, %v705_v7  ;;  %v713_v43 = vsel %vm278_vm2, %v711_v12, %v712_v28  ;;  %v1616_v61 = vmul.f32 %v1614_v2, %v1608_v44  ;;  %v1034_v31 = vmul.f32 %v1032_v63, %v1027_v46 }
 0x124   :  { %v708_v39 = vadd.f32 %v706_v38, %v688_v19  ;;  %v2561_v51 = vpop.permute.xlu1 %896  ;;  %v715_v33 = vadd.f32 %v713_v43, %v695_v27  ;;  %v2566_v14 = vpop.permute.xlu0 %903  ;;  %v1455_v27 = vsel %vm546_vm12, %v1453_v8, %v1454_v56  ;;  %v1644_v7 = vrot.slane %v2484_v10, 2 }
 0x125   :  { %v1645_v12 = vrot.slane %v2484_v10, 4  ;;  %v1240_v22 = vsel %vm759_vm7, %v1238_v6, %v1239_v16  ;;  %v1430_v32 = vrot.slane %v2431_v13, 2  ;;  %v1431_v34 = vrot.slane %v2431_v13, 4 }
 0x126   :  { %1244 = vrot.lane.b32.xlu1 %v1233_v58, %s1956_s16  ;;  %1410 = vrot.lane.b32.xlu0 %v1401_v9, %s1952_s12  ;;  %v1235_v20 = vstv %s2569_s24  ;;  %v1457_v38 = vmul.f32 %v1455_v27, %v1450_v17  ;;  %v1641_v10 = vstv %s2574_s28  ;;  %v1678_v13 = vrot.slane %v2504_v45, 4 }
 0x127   :  { %v1647_v15 = vsel %vm1646_vm13, %v1644_v7, %v1645_v12  ;;  %v1242_v43 = vmul.f32 %v1240_v22, %v1235_v20  ;;  %v1432_v58 = vsel %vm1422_vm9, %v1430_v32, %v1431_v34  ;;  %v1621_v25 = vrot.slane %v2452_v29, 2 }
 0x128   :  { %v724_v3 = vpop.permute.xlu1 %723  ;;  %v731_v48 = vpop.permute.xlu0 %730  ;;  %v1622_v54 = vrot.slane %v2452_v29, 4  ;;  %v1427_v55 = vstv %s2583_s26  ;;  %v1674_v63 = vstv %s2596_s29  ;;  %v1463_v44 = vrot.slane %v2468_v37, 4 }
 0x129   :  { %v725_v1 = vrot.slane %v724_v3, 2  ;;  %v732_v19 = vrot.slane %v731_v48, 2  ;;  %v1618_v29 = vstv %s2605_s4  ;;  %v1651_v17 = vstv %s1875_s5 }
 0x12a   :  { %1436 = vrot.lane.b32.xlu1 %v1425_v0, %s1952_s12  ;;  %1601 = vrot.lane.b32.xlu0 %v1592_v4, %s1948_s27  ;;  %v1623_v0 = vsel %vm1613_vm10, %v1621_v25, %v1622_v54  ;;  %v1462_v4 = vrot.slane %v2468_v37, 2  ;;  %v1683_v22 = vstv %s2633_s7  ;;  %v884_v20 = vstv %s1822_s9 }
 0x12b   :  { %v726_v18 = vsel %vm299_vm6, %v724_v3, %v725_v1  ;;  %v733_v21 = vsel %vm299_vm6, %v731_v48, %v732_v19  ;;  %v1434_v3 = vmul.f32 %v1432_v58, %v1427_v55  ;;  %v1625_v8 = vmul.f32 %v1623_v0, %v1618_v29 }
 0x12c   :  { %v2588_v41 = vadd.f32 %v726_v18, %v708_v39  ;;  %v2591_v23 = vpop.permute.xlu1 %1093  ;;  %v2598_v28 = vadd.f32 %v733_v21, %v715_v33  ;;  %v1677_v39 = vrot.slane %v2504_v45, 2  ;;  %v1649_v33 = vmul.f32 %v1647_v15, %v1641_v10  ;;  %v2638_v16 = vpop.permute.xlu0 %1100 }
 0x12d   :  { %v1464_v56 = vsel %vm546_vm12, %v1462_v4, %v1463_v44  ;;  %v1654_v1 = vrot.slane %v2491_v60, 2  ;;  %v1655_v48 = vrot.slane %v2491_v60, 4  ;;  %v1686_v60 = vrot.slane %v2510_v62, 2 }
 0x12e   :  { %1627 = vrot.lane.b32.xlu1 %v1616_v61, %s1948_s27  ;;  %1043 = vrot.lane.b32.xlu0 %v1034_v31, %s1950_s6  ;;  %s1863_s6 = sld [smem:[#allocation4 + $0x60]]  ;;  %v1679_v45 = vsel %vm335_vm0, %v1677_v39, %v1678_v13  ;;  %v1687_v21 = vrot.slane %v2510_v62, 4  ;;  %v256_v31 = vrot.slane %v2197_v50, 2  ;;  %v898_v62 = vrot.slane %v2561_v51, 2 }
 0x12f   :  { %v1681_v2 = vmul.f32 %v1679_v45, %v1674_v63  ;;  %v1656_v18 = vsel %vm1646_vm13, %v1654_v1, %v1655_v48  ;;  %v264_v10 = vrot.slane %v2130_v57, 2  ;;  %v277_v15 = vrot.slane %v2178_v30, 2 }
 0x130   :  { %v2609_v9 = vpop.permute.xlu1 %340  ;;  %v1658_v7 = vmul.f32 %v1656_v18, %v1651_v17  ;;  %v2648_v12 = vpop.permute.xlu0 %551  ;;  %v1688_v32 = vsel %vm335_vm0, %v1686_v60, %v1687_v21  ;;  %v258_v39 = vsel %vm257_vm14, %v2197_v50, %v256_v31  ;;  %v885_v54 = vmul.f32 %v884_v20, %v2036_v26 }
 0x131   :  { %v1690_v58 = vmul.f32 %v1688_v32, %v1683_v22  ;;  %v899_v63 = vsel %vm257_vm14, %v2561_v51, %v898_v62  ;;  %v265_v50 = vsel %vm257_vm14, %v2130_v57, %v264_v10  ;;  %v306_v45 = vrot.slane %v2156_v11, 2 }
 0x132   :  { %1468 = vrot.lane.b32.xlu1 %v1457_v38, %s1952_s12  ;;  %1251 = vrot.lane.b32.xlu0 %v1242_v43, %s1956_s16  ;;  %s241_s16 = sld [smem:[#allocation4]]  ;;  %v245_v38 = vstv %s1781_s10  ;;  %v285_v43 = vrot.slane %v2144_v5, 2  ;;  %v298_v0 = vrot.slane %v2204_v53, 2 }
 0x133   :  { %v246_v55 = vmul.f32 %v2531_v36, %v245_v38  ;;  %v905_v38 = vrot.slane %v2566_v14, 2 }
 0x134   :  { %v2620_v46 = vpop.permute.xlu1 %373  ;;  %v1459_v37 = vstv %s1863_s6  ;;  %v286_v44 = vsel %vm278_vm2, %v2144_v5, %v285_v43  ;;  %v300_v5 = vsel %vm299_vm6, %v2204_v53, %v298_v0 }
 0x135   :  { %v1466_v19 = vmul.f32 %v1464_v56, %v1459_v37  ;;  %v342_v56 = vrot.slane %v2609_v9, 6  ;;  %v267_v1 = vadd.f32 %v265_v50, %v246_v55  ;;  %v1095_v37 = vrot.slane %v2591_v23, 2 }
 0x136   :  { %1660 = vrot.lane.b32.xlu1 %v1649_v33, %s1948_s27  ;;  %1443 = vrot.lane.b32.xlu0 %v1434_v3, %s1952_s12  ;;  %v279_v3 = vsel %vm278_vm2, %v2178_v30, %v277_v15  ;;  %v375_v17 = vrot.slane %v2620_v46, 6 }
 0x137   :  { %v288_v21 = vadd.f32 %v286_v44, %v267_v1  ;;  %v1096_v20 = vsel %vm257_vm14, %v2591_v23, %v1095_v37  ;;  %v472_v1 = vrot.slane %v2188_v40, 2 }
 0x138   :  { %v2635_v6 = vpop.permute.xlu1 %406  ;;  %v242_v61 = vstv %s241_s16 }
 0x139   :  { %v243_v34 = vmul.f32 %v242_v61, %v2036_v26  ;;  %v408_v22 = vrot.slane %v2635_v6, 6 }
 0x13a   :  { %1692 = vrot.lane.b32.xlu1 %v1681_v2, %s1948_s27  ;;  %1634 = vrot.lane.b32.xlu0 %v1625_v8, %s1948_s27  ;;  %v901_v2 = vadd.f32 %v899_v63, %v885_v54  ;;  %v1081_v8 = vstv %s2652_s25 }
 0x13b   :  { %v260_v33 = vadd.f32 %v258_v39, %v243_v34  ;;  %v1082_v61 = vmul.f32 %v1081_v8, %v2036_v26  ;;  %v409_v23 = vsel %vm335_vm0, %v408_v22, %v2635_v6  ;;  %v473_v22 = vsel %vm257_vm14, %v2188_v40, %v472_v1 }
 0x13c   :  { %v2646_v27 = vpop.permute.xlu1 %543 }
 0x13d   :  { %v281_v48 = vadd.f32 %v279_v3, %v260_v33  ;;  %v1098_v55 = vadd.f32 %v1096_v20, %v1082_v61  ;;  %v906_v3 = vsel %vm257_vm14, %v2566_v14, %v905_v38  ;;  %v1102_v14 = vrot.slane %v2638_v16, 2 }
 0x13e   :  { %1475 = vrot.lane.b32.xlu0 %v1466_v19, %s1952_s12  ;;  %s2677_s12 = sld [smem:[#allocation4 + $0x34]]  ;;  %v307_v19 = vsel %vm299_vm6, %v2156_v11, %v306_v45  ;;  %v499_v20 = vrot.slane %v2183_v35, 2 }
 0x13f   :  { %v309_v34 = vadd.f32 %v307_v19, %v288_v21  ;;  %v302_v53 = vadd.f32 %v300_v5, %v281_v48  ;;  %v1084_v48 = vstv %s2705_s11  ;;  %v479_v21 = vrot.slane %v2170_v24, 2 }
 0x142   :  { %1667 = vrot.lane.b32.xlu0 %v1658_v7, %s1948_s27  ;;  %v343_v7 = vsel %vm335_vm0, %v342_v56, %v2609_v9  ;;  %v376_v9 = vsel %vm335_vm0, %v375_v17, %v2620_v46 }
 0x143   :  { %v345_v39 = vadd.f32 %v343_v7, %v309_v34  ;;  %v461_v7 = vstv %s2714_s13 }
 0x144   :  { %v2661_v13 = vpop.permute.xlu1 %577  ;;  %v2664_v25 = vpop.permute.xlu0 %584  ;;  %v887_v62 = vstv %s2677_s12  ;;  %v462_v38 = vmul.f32 %v2531_v36, %v461_v7 }
 0x145   :  { %v888_v63 = vmul.f32 %v2531_v36, %v887_v62  ;;  %v378_v50 = vadd.f32 %v376_v9, %v345_v39  ;;  %v480_v9 = vsel %vm257_vm14, %v2170_v24, %v479_v21  ;;  %v519_v39 = vrot.slane %v2190_v42, 2 }
 0x146   :  { %1699 = vrot.lane.b32.xlu0 %v1690_v58, %s1948_s27  ;;  %s2699_s27 = sld [smem:[#allocation4 + $0x1]]  ;;  %v553_v24 = vrot.slane %v2648_v12, 6 }
 0x147   :  { %v411_v6 = vadd.f32 %v409_v23, %v378_v50  ;;  %v908_v56 = vadd.f32 %v906_v3, %v888_v63  ;;  %v500_v23 = vsel %vm278_vm2, %v2183_v35, %v499_v20  ;;  %v482_v63 = vadd.f32 %v480_v9, %v462_v38 }
 0x148   :  { %v917_v4 = vpop.permute.xlu1 %916  ;;  %v333_v51 = vpop.permute.xlu0 %332  ;;  %v586_v3 = vrot.slane %v2664_v25, 6 }
 0x149   :  { %v918_v29 = vrot.slane %v917_v4, 2  ;;  %v334_v57 = vrot.slane %v333_v51, 6 }
 0x14b   :  { %v919_v30 = vsel %vm278_vm2, %v917_v4, %v918_v29  ;;  %v336_v11 = vsel %vm335_vm0, %v334_v57, %v333_v51 }
 0x14c   :  { %v2690_v18 = vadd.f32 %v919_v30, %v901_v2  ;;  %v2692_v60 = vpop.permute.xlu1 %756  ;;  %v367_v31 = vpop.permute.xlu0 %366  ;;  %v338_v43 = vadd.f32 %v336_v11, %v302_v53  ;;  %v458_v8 = vstv %s2699_s27  ;;  %v492_v11 = vrot.slane %v2195_v47, 2 }
 0x14d   :  { %v368_v32 = vrot.slane %v367_v31, 6  ;;  %v459_v61 = vmul.f32 %v458_v8, %v2036_v26 }
 0x14e   :  { %v493_v40 = vsel %vm278_vm2, %v2195_v47, %v492_v11  ;;  %v520_v47 = vsel %vm299_vm6, %v2190_v42, %v519_v39 }
 0x14f   :  { %v369_v10 = vsel %vm335_vm0, %v368_v32, %v367_v31  ;;  %v1085_v31 = vmul.f32 %v2531_v36, %v1084_v48  ;;  %v1103_v32 = vsel %vm257_vm14, %v2638_v16, %v1102_v14 }
 0x150   :  { %v1114_v15 = vpop.permute.xlu1 %1113  ;;  %v400_v54 = vpop.permute.xlu0 %399  ;;  %v371_v45 = vadd.f32 %v369_v10, %v338_v43  ;;  %v475_v10 = vadd.f32 %v473_v22, %v459_v61  ;;  %v512_v43 = vrot.slane %v2200_v52, 2 }
 0x151   :  { %v1115_v58 = vrot.slane %v1114_v15, 2  ;;  %v401_v33 = vrot.slane %v400_v54, 6 }
 0x152   :  { %v495_v50 = vadd.f32 %v493_v40, %v475_v10  ;;  %v758_v10 = vrot.slane %v2692_v60, 6 }
 0x153   :  { %v1116_v46 = vsel %vm278_vm2, %v1114_v15, %v1115_v58  ;;  %v402_v4 = vsel %vm335_vm0, %v401_v33, %v400_v54  ;;  %v1105_v15 = vadd.f32 %v1103_v32, %v1085_v31  ;;  %v545_v33 = vrot.slane %v2646_v27, 6 }
 0x154   :  { %v2718_v0 = vadd.f32 %v1116_v46, %v1098_v55  ;;  %v2721_v44 = vpop.permute.xlu1 %1317  ;;  %v404_v29 = vadd.f32 %v402_v4, %v371_v45  ;;  %v924_v51 = vpop.permute.xlu0 %923  ;;  %v513_v45 = vsel %vm299_vm6, %v2200_v52, %v512_v43  ;;  %v579_v46 = vrot.slane %v2661_v13, 6 }
 0x155   :  { %v925_v2 = vrot.slane %v924_v51, 2  ;;  %v515_v8 = vadd.f32 %v513_v45, %v495_v50 }
 0x156   :  { %v2724_v57 = vadd.f32 %v411_v6, %v404_v29  ;;  %v502_v6 = vadd.f32 %v500_v23, %v482_v63  ;;  %v554_v29 = vsel %vm546_vm12, %v553_v24, %v2648_v12  ;;  %v580_v52 = vsel %vm546_vm12, %v579_v46, %v2661_v13 }
 0x157   :  { %v926_v37 = vsel %vm278_vm2, %v924_v51, %v925_v2  ;;  %v547_v51 = vsel %vm546_vm12, %v545_v33, %v2646_v27  ;;  %v760_v23 = vsel %vm759_vm7, %v758_v10, %v2692_v60 }
 0x158   :  { %v2730_v30 = vpop.permute.xlu1 %940  ;;  %v2734_v19 = vrot.slane %v2724_v57, %v2016_v59  ;;  %v2736_v5 = vadd.f32 %v926_v37, %v908_v56  ;;  %v2738_v17 = vpop.permute.xlu0 %764  ;;  %v522_v42 = vadd.f32 %v520_v47, %v502_v6  ;;  %v587_v56 = vsel %vm546_vm12, %v586_v3, %v2664_v25 }
 0x159   :  { %v549_v14 = vadd.f32 %v547_v51, %v515_v8  ;;  %v762_v45 = vadd.f32 %v760_v23, %v2588_v41  ;;  %v428_v41 = vcombine.high %v2724_v57, %v2724_v57  ;;  %v942_v10 = vrot.slane %v2730_v30, 6 }
 0x15a   :  { %444 = vrot.lane.b32.xlu0 %v2734_v19, %s1968_s14  ;;  %v556_v48 = vadd.f32 %v554_v29, %v522_v42  ;;  %v1529_v23 = vstv %s1864_s18 }
 0x15b   :  { %v582_v61 = vadd.f32 %v580_v52, %v549_v14 }
 0x15c   :  { %v611_v34 = vpop.permute.xlu1 %610  ;;  %v1121_v53 = vpop.permute.xlu0 %1120  ;;  %v589_v31 = vadd.f32 %v587_v56, %v556_v48 }
 0x15d   :  { %v1122_v62 = vrot.slane %v1121_v53, 2  ;;  %v612_v2 = vrot.slane %v611_v34, 6 }
 0x15f   :  { %v1123_v16 = vsel %vm278_vm2, %v1121_v53, %v1122_v62  ;;  %v613_v21 = vsel %vm546_vm12, %v612_v2, %v611_v34 }
 0x160   :  { %v791_v58 = vpop.permute.xlu1 %790  ;;  %v2760_v54 = vadd.f32 %v1123_v16, %v1105_v15  ;;  %v2762_v55 = vpop.permute.xlu0 %1324  ;;  %v615_v22 = vadd.f32 %v613_v21, %v582_v61  ;;  %v766_v15 = vrot.slane %v2738_v17, 6  ;;  %v442_v21 = vrot.slane %v428_v41, %v2016_v59 }
 0x161   :  { %v792_v39 = vrot.slane %v791_v58, 6 }
 0x162   :  { %v767_v24 = vsel %vm759_vm7, %v766_v15, %v2738_v17  ;;  %v1308_v15 = vstv %s1851_s17 }
 0x163   :  { %v793_v63 = vsel %vm759_vm7, %v792_v39, %v791_v58  ;;  %v769_v46 = vadd.f32 %v767_v24, %v2598_v28  ;;  %v1326_v39 = vrot.slane %v2762_v55, 2  ;;  %v1532_v24 = vstv %s1865_s19 }
 0x164   :  { %v2774_v4 = vpop.permute.xlu1 %1146  ;;  %v2776_v35 = vpop.permute.xlu0 %947  ;;  %v795_v51 = vadd.f32 %v793_v63, %v762_v45 }
 0x168   :  { %v2786_v1 = vpop.permute.xlu1 %1337  ;;  %v618_v37 = vpop.permute.xlu0 %617 }
 0x169   :  { %v619_v12 = vrot.slane %v618_v37, 6 }
 0x16b   :  { %v620_v27 = vsel %vm546_vm12, %v619_v12, %v618_v37  ;;  %vm450_vm12 = vcmask 416768  }
 0x16c   :  { %v2790_v7 = vpop.permute.xlu1 %1541  ;;  %v622_v11 = vadd.f32 %v620_v27, %v589_v31  ;;  %v798_v13 = vpop.permute.xlu0 %797 }
 0x16d   :  { %v799_v40 = vrot.slane %v798_v13, 6 }
 0x16e   :  { %v2792_v32 = vadd.f32 %v622_v11, %v615_v22 }
 0x16f   :  { %v800_v50 = vsel %vm759_vm7, %v799_v40, %v798_v13  ;;  %v1305_v13 = vstv %s1850_s15  ;;  %v1148_v40 = vrot.slane %v2774_v4, 6 }
 0x170   :  { %v2794_v25 = vpop.permute.xlu1 %972  ;;  %v646_v53 = vrot.slane %v2792_v32, %v2016_v59  ;;  %v2798_v20 = vpop.permute.xlu0 %1153  ;;  %v802_v60 = vadd.f32 %v800_v50, %v769_v46  ;;  %v1306_v63 = vmul.f32 %v1305_v13, %v2036_v26  ;;  %v1309_v50 = vmul.f32 %v2531_v36, %v1308_v15 }
 0x172   :  { %655 = vrot.lane.b32.xlu1 %v646_v53, %s1969_s8  ;;  %v654_v31 = vcombine.high %v646_v53, %v646_v53  ;;  %v949_v53 = vrot.slane %v2776_v35, 6 }
 0x174   :  { %v824_v34 = vpop.permute.xlu1 %823  ;;  %v2801_v62 = vpop.permute.xlu0 %1344 }
 0x175   :  { %v825_v33 = vrot.slane %v824_v34, 6 }
 0x177   :  { %v826_v6 = vsel %vm759_vm7, %v825_v33, %v824_v34  ;;  %v1319_v34 = vrot.slane %v2721_v44, 2 }
 0x178   :  { %v2803_v38 = vpop.permute.xlu1 %1179  ;;  %v2805_v9 = vpop.permute.xlu0 %1548  ;;  %v828_v42 = vadd.f32 %v826_v6, %v795_v51  ;;  %v974_v6 = vrot.slane %v2794_v25, 6  ;;  %v1327_v51 = vsel %vm257_vm14, %v2762_v55, %v1326_v39 }
 0x179   :  { %v1320_v46 = vsel %vm257_vm14, %v2721_v44, %v1319_v34  ;;  %v1149_v44 = vsel %vm809_vm15, %v1148_v40, %v2774_v4  ;;  %v2895_v13 = vadd.f32 %v1327_v51, %v1309_v50  ;;  %v1339_v40 = vrot.slane %v2786_v1, 2 }
 0x17a   :  { %v1322_v55 = vadd.f32 %v1320_v46, %v1306_v63  ;;  %v975_v4 = vsel %vm299_vm6, %v974_v6, %v2794_v25 }
 0x17c   :  { %v2809_v43 = vpop.permute.xlu1 %1370  ;;  %v2811_v16 = vpop.permute.xlu0 %979 }
 0x180   :  { %v2819_v47 = vpop.permute.xlu1 %1561  ;;  %v831_v3 = vpop.permute.xlu0 %830 }
 0x181   :  { %v832_v29 = vrot.slane %v831_v3, 6 }
 0x183   :  { %v833_v2 = vsel %vm759_vm7, %v832_v29, %v831_v3  ;;  %v943_v3 = vsel %vm299_vm6, %v942_v10, %v2730_v30  ;;  %v981_v29 = vrot.slane %v2811_v16, 6  ;;  %v950_v30 = vsel %vm299_vm6, %v949_v53, %v2776_v35 }
 0x184   :  { %v2825_v17 = vpop.permute.xlu1 %1004  ;;  %v835_v58 = vadd.f32 %v833_v2, %v802_v60  ;;  %v2827_v8 = vpop.permute.xlu0 %1186  ;;  %v2871_v60 = vmul.f32 %v1529_v23, %v2036_v26  ;;  %v1155_v2 = vrot.slane %v2798_v20, 6  ;;  %v945_v26 = vadd.f32 %v943_v3, %v2690_v18 }
 0x185   :  { %v982_v35 = vsel %vm299_vm6, %v981_v29, %v2811_v16  ;;  %v1151_v18 = vadd.f32 %v1149_v44, %v2718_v0  ;;  %v952_v34 = vadd.f32 %v950_v30, %v2736_v5  ;;  %v1346_v29 = vrot.slane %v2801_v62, 2 }
 0x186   :  { %v836_v52 = vadd.f32 %v835_v58, %v828_v42  ;;  %v2875_v42 = vmul.f32 %v2531_v36, %v1532_v24  ;;  %v1006_v58 = vrot.slane %v2825_v17, 6  ;;  %v443_v36 = vcombine.high %v2734_v19, %v2734_v19 }
 0x187   :  { %v1156_v10 = vsel %vm809_vm15, %v1155_v2, %v2798_v20  ;;  %v977_v53 = vadd.f32 %v975_v4, %v945_v26  ;;  %v984_v23 = vadd.f32 %v982_v35, %v952_v34 }
 0x188   :  { %v2829_v56 = vpop.permute.xlu1 %1212  ;;  %v2834_v28 = vrot.slane %v836_v52, %v2016_v59  ;;  %v2836_v48 = vpop.permute.xlu0 %1377  ;;  %v852_v12 = vcombine.high %v836_v52, %v836_v52  ;;  %v1007_v15 = vsel %vm299_vm6, %v1006_v58, %v2825_v17  ;;  %v1158_v46 = vadd.f32 %v1156_v10, %v2760_v54 }
 0x189   :  { %v1214_v25 = vrot.slane %v2829_v56, 6  ;;  %v1009_v3 = vadd.f32 %v1007_v15, %v977_v53  ;;  %v1340_v54 = vsel %vm278_vm2, %v2786_v1, %v1339_v40  ;;  %v1379_v1 = vrot.slane %v2836_v48, 6 }
 0x18a   :  { %868 = vrot.lane.b32.xlu0 %v2834_v28, %s1970_s2  ;;  %v866_v11 = vrot.slane %v852_v12, %v2016_v59  ;;  %v1342_v53 = vadd.f32 %v1340_v54, %v1322_v55 }
 0x18c   :  { %v2840_v14 = vpop.permute.xlu1 %1403  ;;  %v2842_v37 = vpop.permute.xlu0 %1568 }
 0x18e   :  { %448 = vrot.lane.b32.xlu0 %v442_v21, %s1968_s14  ;;  %v1181_v21 = vrot.slane %v2803_v38, 6 }
 0x190   :  { %v2846_v57 = vpop.permute.xlu1 %1594  ;;  %v1012_v61 = vpop.permute.xlu0 %1011  ;;  %v1182_v0 = vsel %vm809_vm15, %v1181_v21, %v2803_v38  ;;  %v1215_v38 = vsel %vm809_vm15, %v1214_v25, %v2829_v56 }
 0x191   :  { %v1013_v52 = vrot.slane %v1012_v61, 6  ;;  %v1184_v2 = vadd.f32 %v1182_v0, %v1151_v18  ;;  %v1372_v18 = vrot.slane %v2809_v43, 6 }
 0x192   :  { %657 = vrot.lane.b32.xlu0 %v654_v31, %s1969_s8  ;;  %v1188_v31 = vrot.slane %v2827_v8, 6 }
 0x193   :  { %v1014_v39 = vsel %vm299_vm6, %v1013_v52, %v1012_v61  ;;  %v1543_v61 = vrot.slane %v2790_v7, 2  ;;  %v1550_v52 = vrot.slane %v2805_v9, 2  ;;  %v1217_v4 = vadd.f32 %v1215_v38, %v1184_v2 }
 0x194   :  { %v1037_v27 = vpop.permute.xlu1 %1036  ;;  %v2849_v22 = vpop.permute.xlu0 %1219  ;;  %v1189_v20 = vsel %vm809_vm15, %v1188_v31, %v2827_v8  ;;  %v1016_v6 = vadd.f32 %v1014_v39, %v984_v23 }
 0x195   :  { %v1221_v16 = vrot.slane %v2849_v22, 6  ;;  %v1544_v56 = vsel %vm257_vm14, %v2790_v7, %v1543_v61  ;;  %v1551_v39 = vsel %vm257_vm14, %v2805_v9, %v1550_v52  ;;  %v1380_v9 = vsel %vm596_vm11, %v1379_v1, %v2836_v48 }
 0x196   :  { %872 = vrot.lane.b32.xlu0 %v866_v11, %s1970_s2  ;;  %v1038_v11 = vrot.slane %v1037_v27, 6  ;;  %v1546_v0 = vadd.f32 %v1544_v56, %v2871_v60  ;;  %v1553_v55 = vadd.f32 %v1551_v39, %v2875_v42  ;;  %v1570_v60 = vrot.slane %v2842_v37, 2 }
 0x197   :  { %v1222_v51 = vsel %vm809_vm15, %v1221_v16, %v2849_v22  ;;  %v1405_v16 = vrot.slane %v2840_v14, 6 }
 0x198   :  { %v1245_v33 = vpop.permute.xlu1 %1244  ;;  %v2860_v45 = vpop.permute.xlu0 %1410  ;;  %v1039_v17 = vsel %vm299_vm6, %v1038_v11, %v1037_v27  ;;  %v1191_v27 = vadd.f32 %v1189_v20, %v1158_v46  ;;  %v639_v11 = vcombine.high %v2792_v32, %v2792_v32  ;;  %v1563_v32 = vrot.slane %v2819_v47, 2 }
 0x199   :  { %v1246_v63 = vrot.slane %v1245_v33, 6  ;;  %v1041_v44 = vadd.f32 %v1039_v17, %v1009_v3  ;;  %v1412_v40 = vrot.slane %v2860_v45, 6  ;;  %v1406_v48 = vsel %vm596_vm11, %v1405_v16, %v2840_v14 }
 0x19a   :  { %v1224_v22 = vadd.f32 %v1222_v51, %v1191_v27  ;;  %v653_v46 = vrot.slane %v639_v11, %v2016_v59  ;;  %v1596_v51 = vrot.slane %v2846_v57, 6  ;;  %v1571_v27 = vsel %vm278_vm2, %v2842_v37, %v1570_v60 }
 0x19b   :  { %v1247_v26 = vsel %vm809_vm15, %v1246_v63, %v1245_v33  ;;  %v1347_v33 = vsel %vm278_vm2, %v2801_v62, %v1346_v29  ;;  %v1413_v3 = vsel %vm596_vm11, %v1412_v40, %v2860_v45  ;;  %v867_v37 = vcombine.high %v2834_v28, %v2834_v28 }
 0x19c   :  { %v2882_v41 = vpop.permute.xlu1 %1436  ;;  %v2886_v12 = vpop.permute.xlu0 %1601  ;;  %v1249_v10 = vadd.f32 %v1247_v26, %v1217_v4  ;;  %v1349_v63 = vadd.f32 %v1347_v33, %v2895_v13  ;;  %v1597_v56 = vsel %vm385_vm8, %v1596_v51, %v2846_v57  ;;  %v1573_v11 = vadd.f32 %v1571_v27, %v1553_v55  ;;  %v3007_v51 = vld [vmem:[%s3120_s1] sm:$0x3] }
 0x19d   :  { %v1438_v20 = vrot.slane %v2882_v41, 6  ;;  %v1603_v14 = vrot.slane %v2886_v12, 6  ;;  %vm413_vm14 = vcmp.ge.s32.totalorder %v3007_v51, 3  ;;  %vm838_vm3 = vcmp.lt.s32.totalorder %v3007_v51, 17 }
 0x19e   :  { %v1382_v42 = vadd.f32 %v1380_v9, %v1349_v63  ;;  %vm1259_vm7 = vcmp.lt.s32.totalorder %v3007_v51, 15  ;;  %vm1482_vm9 = vcmp.ge.s32.totalorder %v3007_v51, 4294967294  ;;  %vm1483_vm10 = vcmp.lt.s32.totalorder %v3007_v51, 14 }
 0x19f   :  { %v1604_v4 = vsel %vm385_vm8, %v1603_v14, %v2886_v12 }
 0x1a0   :  { %v2909_v5 = vpop.permute.xlu1 %1627  ;;  %v1044_v24 = vpop.permute.xlu0 %1043 }
 0x1a1   :  { %v1045_v50 = vrot.slane %v1044_v24, 6  ;;  %v1629_v19 = vrot.slane %v2909_v5, 6 }
 0x1a3   :  { %v1046_v8 = vsel %vm299_vm6, %v1045_v50, %v1044_v24  ;;  %v1373_v24 = vsel %vm596_vm11, %v1372_v18, %v2809_v43  ;;  %v1564_v43 = vsel %vm278_vm2, %v2819_v47, %v1563_v32  ;;  %v1439_v47 = vsel %vm596_vm11, %v1438_v20, %v2882_v41 }
 0x1a4   :  { %v1048_v30 = vadd.f32 %v1046_v8, %v1016_v6  ;;  %v1252_v58 = vpop.permute.xlu0 %1251  ;;  %v1469_v31 = vpop.permute.xlu1 %1468  ;;  %v1375_v6 = vadd.f32 %v1373_v24, %v1342_v53  ;;  %v1566_v8 = vadd.f32 %v1564_v43, %v1546_v0  ;;  %v1630_v28 = vsel %vm385_vm8, %v1629_v19, %v2909_v5 }
 0x1a5   :  { %v1253_v21 = vrot.slane %v1252_v58, 6  ;;  %v1470_v13 = vrot.slane %v1469_v31, 6  ;;  %vm837_vm2 = vcmp.ge.s32.totalorder %v3007_v51, 1  ;;  %vm1258_vm6 = vcmp.ge.s32.totalorder %v3007_v51, 4294967295 }
 0x1a6   :  { %v2928_v35 = vadd.f32 %v1048_v30, %v1041_v44  ;;  %v1408_v2 = vadd.f32 %v1406_v48, %v1375_v6  ;;  %v1415_v44 = vadd.f32 %v1413_v3, %v1382_v42  ;;  %v1599_v12 = vadd.f32 %v1597_v56, %v1566_v8  ;;  %vm839_vm5 = vmand %vm837_vm2, %vm838_vm3 }
 0x1a7   :  { %v1254_v34 = vsel %vm809_vm15, %v1253_v21, %v1252_v58  ;;  %vm414_vm15 = vcmp.lt.s32.totalorder %v3007_v51, 19  ;;  %v3020_v8 = vsub.s32 0, %v2012_v49  ;;  %vm1260_vm13 = vmand %vm1258_vm6, %vm1259_vm7  ;;  %vm874_vm2 = vcmask 400384  }
 0x1a8   :  { %v1058_v7 = vrot.slane %v2928_v35, %v2016_v59  ;;  %v1256_v15 = vadd.f32 %v1254_v34, %v1224_v22  ;;  %v1444_v25 = vpop.permute.xlu0 %1443  ;;  %v1661_v50 = vpop.permute.xlu1 %1660  ;;  %v1441_v54 = vadd.f32 %v1439_v47, %v1408_v2  ;;  %v1051_v18 = vcombine.high %v2928_v35, %v2928_v35  ;;  %vm415_vm4 = vmand %vm413_vm14, %vm414_vm15 }
 0x1a9   :  { %v1445_v17 = vrot.slane %v1444_v25, 6  ;;  %v1662_v22 = vrot.slane %v1661_v50, 6  ;;  %v1632_v32 = vadd.f32 %v1630_v28, %v1599_v12  ;;  %v1975_v2 = vmov 0  }
 0x1aa   :  { %v1257_v23 = vadd.f32 %v1256_v15, %v1249_v10  ;;  %1067 = vrot.lane.b32.xlu1 %v1058_v7, %s1971_s20  ;;  %v1066_v62 = vcombine.high %v1058_v7, %v1058_v7  ;;  %v1606_v15 = vadd.f32 %v1604_v4, %v1573_v11  ;;  %v1065_v5 = vrot.slane %v1051_v18, %v2016_v59 }
 0x1ab   :  { %v1446_v45 = vsel %vm596_vm11, %v1445_v17, %v1444_v25  ;;  %v1663_v39 = vsel %vm385_vm8, %v1662_v22, %v1661_v50  ;;  %vm1707_vm6 = vcmp.lt.s32.totalorder %v3007_v51, 13  ;;  %vm1295_vm7 = vcmask 384000  }
 0x1ac   :  { %v1635_v61 = vpop.permute.xlu0 %1634  ;;  %1069 = vrot.lane.b32.xlu0 %v1066_v62, %s1971_s20  ;;  %v1273_v29 = vcombine.high %v1257_v23, %v1257_v23  ;;  %v1280_v38 = vrot.slane %v1257_v23, %v2016_v59  ;;  %v1448_v52 = vadd.f32 %v1446_v45, %v1415_v44  ;;  %v1693_v26 = vpop.permute.xlu1 %1692  ;;  %v1665_v62 = vadd.f32 %v1663_v39, %v1632_v32 }
 0x1ad   :  { %v1636_v58 = vrot.slane %v1635_v61, 6  ;;  %v1694_v10 = vrot.slane %v1693_v26, 6  ;;  %v416_v44 = vsel %vm415_vm4, 1, %v1975_v2 }
 0x1ae   :  { %446 = vrot.lane.b32.xlu1 %v443_v36, %s1968_s14  ;;  %v1471_v36 = vsel %vm596_vm11, %v1470_v13, %v1469_v31  ;;  %v1287_v21 = vrot.slane %v1273_v29, %v2016_v59  ;;  %v1288_v55 = vcombine.high %v1280_v38, %v1280_v38 }
 0x1af   :  { %v1473_v1 = vadd.f32 %v1471_v36, %v1441_v54  ;;  %v1637_v57 = vsel %vm385_vm8, %v1636_v58, %v1635_v61  ;;  %v1695_v0 = vsel %vm385_vm8, %v1694_v10, %v1693_v26  ;;  %v840_v36 = vsel %vm839_vm5, 1, %v1975_v2 }
 0x1b0   :  { %v1476_v30 = vpop.permute.xlu0 %1475  ;;  %1289 = vrot.lane.b32.xlu0 %v1280_v38, %s1972_s0  ;;  %v1639_v16 = vadd.f32 %v1637_v57, %v1606_v15  ;;  %v1697_v17 = vadd.f32 %v1695_v0, %v1665_v62  ;;  %vm1706_vm5 = vcmp.ge.s32.totalorder %v3007_v51, 4294967293 }
 0x1b1   :  { %v1477_v41 = vrot.slane %v1476_v30, 6 }
 0x1b2   :  { %659 = vrot.lane.b32.xlu1 %v653_v46, %s1969_s8 }
 0x1b3   :  { %v1478_v31 = vsel %vm596_vm11, %v1477_v41, %v1476_v30  ;;  %vm625_vm11 = vcmp.lt.s32.totalorder %v3007_v51, 18  ;;  %v3023_v30 = vsub.s32 1, %v2012_v49  ;;  %v420_v41 = vrot.slane %v416_v44, %v3020_v8 }
 0x1b4   :  { %v1480_v34 = vadd.f32 %v1478_v31, %v1448_v52  ;;  %v1668_v33 = vpop.permute.xlu0 %1667  ;;  %1293 = vrot.lane.b32.xlu0 %v1287_v21, %s1972_s0  ;;  %v844_v49 = vrot.slane %v840_v36, %v3020_v8 }
 0x1b5   :  { %v1669_v7 = vrot.slane %v1668_v33, 6  ;;  %v424_v54 = vrot.slane %v416_v44, %v3023_v30  ;;  %vm3039_vm14 = vcmp.eq.s32.totalorder %v420_v41, 1 }
 0x1b6   :  { %v1481_v25 = vadd.f32 %v1480_v34, %v1473_v1  ;;  %870 = vrot.lane.b32.xlu1 %v867_v37, %s1970_s2  ;;  %v848_v37 = vrot.slane %v840_v36, %v3023_v30  ;;  %vm3053_vm3 = vcmp.eq.s32.totalorder %v844_v49, 1 }
 0x1b7   :  { %v1670_v35 = vsel %vm385_vm8, %v1669_v7, %v1668_v33  ;;  %vm3043_vm15 = vcmp.eq.s32.totalorder %v424_v54, 1  ;;  %v1261_v33 = vsel %vm1260_vm13, 1, %v1975_v2 }
 0x1b8   :  { %v1504_v40 = vrot.slane %v1481_v25, %v2016_v59  ;;  %v1700_v53 = vpop.permute.xlu0 %1699  ;;  %v1672_v24 = vadd.f32 %v1670_v35, %v1639_v16  ;;  %v1497_v50 = vcombine.high %v1481_v25, %v1481_v25  ;;  %vm3057_vm4 = vcmp.eq.s32.totalorder %v848_v37, 1 }
 0x1b9   :  { %v1701_v23 = vrot.slane %v1700_v53, 6  ;;  %v1265_v32 = vrot.slane %v1261_v33, %v3020_v8  ;;  %v1269_v16 = vrot.slane %v1261_v33, %v3023_v30 }
 0x1ba   :  { %1071 = vrot.lane.b32.xlu1 %v1065_v5, %s1971_s20  ;;  %v1512_v9 = vcombine.high %v1504_v40, %v1504_v40  ;;  %v1511_v43 = vrot.slane %v1497_v50, %v2016_v59 }
 0x1bb   :  { %v1702_v20 = vsel %vm385_vm8, %v1701_v23, %v1700_v53  ;;  %vm624_vm8 = vcmp.ge.s32.totalorder %v3007_v51, 2  ;;  %vm3085_vm13 = vcmp.eq.s32.totalorder %v1269_v16, 1 }
 0x1bc   :  { %v1704_v63 = vadd.f32 %v1702_v20, %v1672_v24  ;;  %1515 = vrot.lane.b32.xlu0 %v1512_v9, %s1973_s21  ;;  %vm626_vm1 = vmand %vm624_vm8, %vm625_vm11  ;;  %vm661_vm8 = vcmask 408576  }
 0x1bd   :  { %v627_v27 = vsel %vm626_vm1, 1, %v1975_v2  ;;  %vm1484_vm11 = vmand %vm1482_vm9, %vm1483_vm10  ;;  %vm1073_vm10 = vcmask 392192  }
 0x1be   :  { %v1705_v60 = vadd.f32 %v1704_v63, %v1697_v17  ;;  %1291 = vrot.lane.b32.xlu1 %v1288_v55, %s1972_s0  ;;  %v631_v58 = vrot.slane %v627_v27, %v3020_v8  ;;  %v635_v26 = vrot.slane %v627_v27, %v3023_v30  ;;  %v1485_v57 = vsel %vm1484_vm11, 1, %v1975_v2  ;;  %vm1708_vm9 = vmand %vm1706_vm5, %vm1707_vm6 }
 0x1bf   :  { %v1489_v53 = vrot.slane %v1485_v57, %v3020_v8  ;;  %v1493_v17 = vrot.slane %v1485_v57, %v3023_v30  ;;  %v1709_v50 = vsel %vm1708_vm9, 1, %v1975_v2 }
 0x1c0   :  { %v1721_v61 = vcombine.high %v1705_v60, %v1705_v60  ;;  %v1728_v46 = vrot.slane %v1705_v60, %v2016_v59  ;;  %vm3035_vm0 = vcmp.eq.s32.totalorder %v631_v58, 1  ;;  %vm3047_vm1 = vcmp.eq.s32.totalorder %v635_v26, 1 }
 0x1c1   :  { %vm3098_vm11 = vcmp.eq.s32.totalorder %v1493_v17, 1  ;;  %v1717_v51 = vrot.slane %v1709_v50, %v3023_v30 }
 0x1c2   :  { %1513 = vrot.lane.b32.xlu1 %v1504_v40, %s1973_s21  ;;  %1737 = vrot.lane.b32.xlu0 %v1728_v46, %s1974_s30  ;;  %v1735_v48 = vrot.slane %v1721_v61, %v2016_v59  ;;  %v1736_v3 = vcombine.high %v1728_v46, %v1728_v46 }
 0x1c6   :  { %1517 = vrot.lane.b32.xlu1 %v1511_v43, %s1973_s21  ;;  %1741 = vrot.lane.b32.xlu0 %v1735_v48, %s1974_s30 }
 0x1ca   :  { %1739 = vrot.lane.b32.xlu1 %v1736_v3, %s1974_s30 }
 0x1cc   :  { %v445_v13 = vpop.permute.xlu0 %444 }
 0x1e4   :  { %v656_v29 = vpop.permute.xlu1 %655 }
 0x1fc   :  { %v869_v6 = vpop.permute.xlu0 %868 }
 0x200   :  { %v449_v42 = vpop.permute.xlu0 %448 }
 0x204   :  { %v658_v38 = vpop.permute.xlu0 %657 }
 0x205   :  { %v662_v7 = vsel %vm661_vm8, %v656_v29, %v658_v38 }
 0x206   :  { %v666_v5 = vsel %vm3035_vm0, %v662_v7, 0.0  ;;  %vm1519_vm0 = vcmask 375808  }
 0x208   :  { %v873_v59 = vpop.permute.xlu0 %872 }
 0x21c   :  { %v3009_v47 = vpop.permute.xlu1 %1067 }
 0x21e   :  { %v3017_v45 = vpop.permute.xlu0 %1069 }
 0x220   :  { %v447_v14 = vpop.permute.xlu1 %446 }
 0x221   :  { %v451_v18 = vsel %vm450_vm12, %v445_v13, %v447_v14  ;;  %v452_v12 = vsel %vm450_vm12, %v447_v14, %v449_v42  ;;  %vm3081_vm12 = vcmp.eq.s32.totalorder %v1265_v32, 1 }
 0x222   :  { %v1290_v52 = vpop.permute.xlu0 %1289  ;;  %v455_v39 = vsel %vm3039_vm14, %v451_v18, 0.0  ;;  %v456_v0 = vsel %vm3043_vm15, %v452_v12, 0.0  ;;  %vm1743_vm14 = vcmask 367616  }
 0x223   :  { %v668_v9 = vadd.f32 %v666_v5, %v455_v39 }
 0x224   :  { %v660_v19 = vpop.permute.xlu1 %659 }
 0x225   :  { %v663_v1 = vsel %vm661_vm8, %v658_v38, %v660_v19  ;;  %vm3093_vm8 = vcmp.eq.s32.totalorder %v1489_v53, 1  ;;  %v1713_v38 = vrot.slane %v1709_v50, %v3020_v8 }
 0x226   :  { %v1294_v28 = vpop.permute.xlu0 %1293  ;;  %v667_v35 = vsel %vm3047_vm1, %v663_v1, 0.0  ;;  %vm1719_vm1 = vcmp.eq.s32.totalorder %v1717_v51, 1 }
 0x227   :  { %v669_v20 = vadd.f32 %v667_v35, %v456_v0  ;;  %vm1718_vm15 = vcmp.eq.s32.totalorder %v1713_v38, 1 }
 0x228   :  { %v871_v21 = vpop.permute.xlu1 %870 }
 0x229   :  { %v875_v15 = vsel %vm874_vm2, %v869_v6, %v871_v21  ;;  %v876_v25 = vsel %vm874_vm2, %v871_v21, %v873_v59  ;;  %v1074_v59 = vsel %vm1073_vm10, %v3009_v47, %v3017_v45 }
 0x22a   :  { %v879_v23 = vsel %vm3053_vm3, %v875_v15, 0.0  ;;  %v880_v62 = vsel %vm3057_vm4, %v876_v25, 0.0 }
 0x22b   :  { %v881_v61 = vadd.f32 %v879_v23, %v668_v9  ;;  %v882_v46 = vadd.f32 %v880_v62, %v669_v20 }
 0x22c   :  { %v1072_v11 = vpop.permute.xlu1 %1071 }
 0x22d   :  { %v1075_v3 = vsel %vm1073_vm10, %v3017_v45, %v1072_v11  ;;  %v1078_v19 = vadd.f32 %v1074_v59, %v881_v61 }
 0x22e   :  { %v1516_v24 = vpop.permute.xlu0 %1515  ;;  %v1079_v44 = vadd.f32 %v1075_v3, %v882_v46 }
 0x230   :  { %v1292_v40 = vpop.permute.xlu1 %1291 }
 0x231   :  { %v1296_v43 = vsel %vm1295_vm7, %v1290_v52, %v1292_v40  ;;  %v1297_v48 = vsel %vm1295_vm7, %v1292_v40, %v1294_v28 }
 0x232   :  { %v1300_v14 = vsel %vm3081_vm12, %v1296_v43, 0.0  ;;  %v1301_v2 = vsel %vm3085_vm13, %v1297_v48, 0.0 }
 0x233   :  { %v1302_v58 = vadd.f32 %v1300_v14, %v1078_v19  ;;  %v1303_v47 = vadd.f32 %v1301_v2, %v1079_v44 }
 0x234   :  { %v1514_v60 = vpop.permute.xlu1 %1513  ;;  %v1738_v6 = vpop.permute.xlu0 %1737 }
 0x235   :  { %v1520_v42 = vsel %vm1519_vm0, %v1514_v60, %v1516_v24 }
 0x236   :  { %v1524_v8 = vsel %vm3093_vm8, %v1520_v42, 0.0 }
 0x237   :  { %v1526_v54 = vadd.f32 %v1524_v8, %v1302_v58 }
 0x238   :  { %v1518_v27 = vpop.permute.xlu1 %1517  ;;  %v1742_v45 = vpop.permute.xlu0 %1741 }
 0x239   :  { %v1521_v36 = vsel %vm1519_vm0, %v1516_v24, %v1518_v27 }
 0x23a   :  { %v1525_v30 = vsel %vm3098_vm11, %v1521_v36, 0.0 }
 0x23b   :  { %v1527_v52 = vadd.f32 %v1525_v30, %v1303_v47 }
 0x23c   :  { %v1740_v41 = vpop.permute.xlu1 %1739 }
 0x23d   :  { %v1744_v26 = vsel %vm1743_vm14, %v1738_v6, %v1740_v41  ;;  %v1745_v21 = vsel %vm1743_vm14, %v1740_v41, %v1742_v45 }
 0x23e   :  { %v1748_v49 = vsel %vm1718_vm15, %v1744_v26, 0.0  ;;  %v1749_v37 = vsel %vm1719_vm1, %v1745_v21, 0.0 }
 0x23f   :  { %v1750_v56 = vadd.f32 %v1748_v49, %v1526_v54  ;;  %v1751_v4 = vadd.f32 %v1749_v37, %v1527_v52 }
 0x241   :  { %v1878_v22 = vmul.f32 -1.442695, %v1750_v56  ;;  %v1879_v31 = vmul.f32 -1.442695, %v1751_v4 }
 0x243   :  { %1918 = vpow2.f32 %v1878_v22 }
 0x244   :  { %1920 = vpow2.f32 %v1879_v31 }
 0x24d   :  { %v1919_v11 = vpop.eup %1918 }
 0x24e   :  { %v1921_v18 = vpop.eup %1920  ;;  %v1758_v1 = vadd.f32 1.0, %v1919_v11 }
 0x24f   :  { %v1759_v34 = vadd.f32 1.0, %v1921_v18 }
 0x250   :  { %1922 = vrcp.f32 %v1758_v1 }
 0x251   :  { %1924 = vrcp.f32 %v1759_v34 }
 0x25a   :  { %v1923_v33 = vpop.eup %1922 }
 0x25b   :  { %v1925_v28 = vpop.eup %1924 }
 0x25c   :  { %v1766_v10 = vcombine.low %v1923_v33, %v1925_v28 }
 0x25e   :  { %1880 = vst.sshfl [vmem:[%s3122_s3] sm:$0x33 pattern:$0x76325410] %v1766_v10 }
 0x25f   :  { %1780 = vsyncpa [#allocation5], 1 }

</bundles_post_ra>
